<compile_context>
chip_gen: v7x
topology: tpu7x:2x2x1
jax: 0.10.0
libtpu: 0.0.40
codegen_flags: <defaults>
</compile_context>

<pallas_src>
import math
from functools import partial

import jax
import jax.numpy as jnp
from jax.experimental import pallas as pl
from jax.experimental.pallas import tpu as pltpu

# ---------------- config (small, consistent with the module's args.*) --------
SRC_VOCAB = 16   # args.src_vocab_size_e
D_MODEL   = 32   # args.d_model
D_K       = 8    # args.d_k_e
D_V       = 8    # args.d_v_e
N_HEADS   = 4    # args.n_heads_e
D_FF      = 64   # args.d_ff_e
N_LAYERS  = 2    # args.n_layers_e
B, S      = 2, 8 # batch, sequence length


def _layer_norm_fast(v, eps=1e-5):
    # Two independent reductions; var = E[x^2] - mean^2 (shorter dep chain).
    inv_n = 1.0 / v.shape[-1]
    mu = jnp.sum(v, axis=-1, keepdims=True) * inv_n
    ms = jnp.sum(v * v, axis=-1, keepdims=True) * inv_n
    var = ms - mu * mu
    return (v - mu) * jax.lax.rsqrt(var + eps)


# ---------------- Pallas kernel: fully fused Encoder_E forward ---------------
def encoder_stack_kernel(ids_col_ref, ids_row_ref, emb_ref, pe_ref,
                         wq_ref, wk_ref, wv_ref, wo_ref, w1_ref, w2_ref,
                         o_ref, *, n_layers, n_heads, d_k, b, s, vocab):
    f32 = jnp.float32
    bs = b * s
    scale = 1.0 / math.sqrt(d_k)

    # ---- embedding lookup (one-hot MXU matmul) + positional encoding ----
    ids_col = ids_col_ref[...]                                       # (BS,1) i32
    onehot = (ids_col ==
              jax.lax.broadcasted_iota(jnp.int32, (bs, vocab), 1)).astype(f32)
    x = jnp.dot(onehot, emb_ref[...], preferred_element_type=f32) + pe_ref[...]

    # ---- pad + causal + cross-batch additive bias, built once in-kernel ----
    q_idx = jax.lax.broadcasted_iota(jnp.int32, (bs, bs), 0)
    k_idx = jax.lax.broadcasted_iota(jnp.int32, (bs, bs), 1)
    if s & (s - 1) == 0:               # static: s is a power of two -> shifts
        shift = s.bit_length() - 1
        q_b, k_b = q_idx >> shift, k_idx >> shift
        q_p, k_p = q_idx & (s - 1), k_idx & (s - 1)
    else:
        q_b, k_b = q_idx // s, k_idx // s
        q_p, k_p = q_idx % s, k_idx % s
    key_ok = ids_row_ref[...] != 0                                   # (1,BS)
    valid = (q_b == k_b) & (k_p <= q_p) & key_ok
    bias = jnp.where(valid, 0.0, -1e9).astype(f32)                   # (BS,BS)

    for l in range(n_layers):          # static unroll over layers
        wq_l, wk_l, wv_l, wo_l = wq_ref[l], wk_ref[l], wv_ref[l], wo_ref[l]
        acc = x                        # residual folded into the head-sum
        for h in range(n_heads):       # static unroll; all matmuls are 2-D
            qh = jnp.dot(x, wq_l[h], preferred_element_type=f32)     # (BS,dk)
            kh = jnp.dot(x, wk_l[h], preferred_element_type=f32)     # (BS,dk)
            vh = jnp.dot(x, wv_l[h], preferred_element_type=f32)     # (BS,dv)
            sc = jnp.einsum('qd,kd->qk', qh, kh,
                            preferred_element_type=f32) * scale + bias
            m = jnp.max(sc, axis=-1, keepdims=True)
            e = jnp.exp(sc - m)
            p = e * pl.reciprocal(jnp.sum(e, axis=-1, keepdims=True),
                                  approx=True)                       # EUP
            ch = jnp.dot(p, vh, preferred_element_type=f32)          # (BS,dv)
            # head merge == concat-then-matmul == sum of per-head projections
            acc = acc + jnp.dot(ch, wo_l[h], preferred_element_type=f32)

        y = _layer_norm_fast(acc)

        # position-wise FFN: Linear -> ReLU -> Linear, residual + LayerNorm
        h1 = jnp.maximum(
            jnp.dot(y, w1_ref[l], preferred_element_type=f32), 0.0)
        ff = jnp.dot(h1, w2_ref[l], preferred_element_type=f32)
        x = _layer_norm_fast(ff + y)

    # ---- emit only the last-token row of each batch: (B, D) ----
    rows = [x[(i + 1) * s - 1:(i + 1) * s, :] for i in range(b)]
    o_ref[...] = jnp.concatenate(rows, axis=0).astype(o_ref.dtype)


def encoder_stack(ids_col, ids_row, emb, pe_flat, wq, wk, wv, wo, w1, w2, *, b, s):
    n_layers, n_heads, d_model, d_k = wq.shape
    vocab = emb.shape[0]
    kernel = partial(encoder_stack_kernel, n_layers=n_layers, n_heads=n_heads,
                     d_k=d_k, b=b, s=s, vocab=vocab)
    vmem = pl.BlockSpec(memory_space=pltpu.MemorySpace.VMEM)
    # Single grid-less invocation: ids, embedding table, PE slab and all layer
    # weights (~70 KiB total) are resident in VMEM for the whole stack.
    return pl.pallas_call(
        kernel,
        out_shape=jax.ShapeDtypeStruct((b, d_model), jnp.float32),
        in_specs=[vmem] * 10,
        out_specs=vmem,
    )(ids_col, ids_row, emb, pe_flat, wq, wk, wv, wo, w1, w2)


# ---------------- glue: positional-encoding constant + param init ------------
def positional_encoding(seq_len, d_model):
    position = jnp.arange(seq_len, dtype=jnp.float32)[:, None]
    div_term = jnp.exp(jnp.arange(0, d_model, 2, dtype=jnp.float32)
                       * (-math.log(10000.0) / d_model))
    pe = jnp.zeros((seq_len, d_model), jnp.float32)
    pe = pe.at[:, 0::2].set(jnp.sin(position * div_term))
    pe = pe.at[:, 1::2].set(jnp.cos(position * div_term))
    return pe  # (S, D)


def init_params(key):
    params = {}
    k_emb, key = jax.random.split(key)
    params["emb"] = 0.05 * jax.random.normal(
        k_emb, (SRC_VOCAB + 1, D_MODEL), jnp.float32)

    def w(k, shape):
        return 0.05 * jax.random.normal(k, shape, jnp.float32)

    wq, wk, wv, wo, w1, w2 = [], [], [], [], [], []
    for _ in range(N_LAYERS):
        ks = jax.random.split(key, 7)
        key = ks[0]
        wq.append(w(ks[1], (N_HEADS, D_MODEL, D_K)))
        wk.append(w(ks[2], (N_HEADS, D_MODEL, D_K)))
        wv.append(w(ks[3], (N_HEADS, D_MODEL, D_V)))
        wo.append(w(ks[4], (N_HEADS, D_V, D_MODEL)))
        w1.append(w(ks[5], (D_MODEL, D_FF)))
        w2.append(w(ks[6], (D_FF, D_MODEL)))
    params["wq"] = jnp.stack(wq)   # (L, H, D, d_k)
    params["wk"] = jnp.stack(wk)   # (L, H, D, d_k)
    params["wv"] = jnp.stack(wv)   # (L, H, D, d_v)
    params["wo"] = jnp.stack(wo)   # (L, H, d_v, D)
    params["w1"] = jnp.stack(w1)   # (L, D, d_ff)
    params["w2"] = jnp.stack(w2)   # (L, d_ff, D)
    return params


@jax.jit
def encoder_e_forward(params, enc_inputs):
    bsz, seq = enc_inputs.shape
    # PE slab is input-independent -> constant-folded by XLA at compile time.
    pe_flat = jnp.tile(positional_encoding(seq, D_MODEL), (bsz, 1))   # (BS, D)
    ids_col = enc_inputs.reshape(bsz * seq, 1).astype(jnp.int32)      # (BS, 1)
    ids_row = enc_inputs.reshape(1, bsz * seq).astype(jnp.int32)      # (1, BS)
    return encoder_stack(ids_col, ids_row, params["emb"], pe_flat,
                         params["wq"], params["wk"], params["wv"],
                         params["wo"], params["w1"], params["w2"],
                         b=bsz, s=seq)                                # (B, D)


# ---------------- pure-JAX reference (mirrors the PyTorch module) ------------
def _layer_norm_ref(v, eps=1e-5):
    mu = jnp.mean(v, axis=-1, keepdims=True)
    var = jnp.mean((v - mu) ** 2, axis=-1, keepdims=True)
    return (v - mu) * jax.lax.rsqrt(var + eps)


def encoder_e_reference(params, enc_inputs):
    bsz, seq = enc_inputs.shape
    x = params["emb"][enc_inputs] + positional_encoding(seq, D_MODEL)[None]
    pad = jnp.broadcast_to((enc_inputs == 0)[:, None, :], (bsz, seq, seq))
    subseq = jnp.triu(jnp.ones((seq, seq), bool), k=1)[None]
    mask = (pad | subseq)[:, None]                                   # (B,1,S,S)
    for l in range(N_LAYERS):
        q = jnp.einsum('bsd,hdk->bhsk', x, params["wq"][l])
        k = jnp.einsum('bsd,hdk->bhsk', x, params["wk"][l])
        v = jnp.einsum('bsd,hdv->bhsv', x, params["wv"][l])
        scores = jnp.einsum('bhqd,bhkd->bhqk', q, k) / math.sqrt(D_K)
        scores = jnp.where(mask, -1e9, scores)
        attn = jax.nn.softmax(scores, axis=-1)
        ctx = jnp.einsum('bhqk,bhkv->bhqv', attn, v)
        y = _layer_norm_ref(jnp.einsum('bhqv,hvd->bqd', ctx, params["wo"][l]) + x)
        ff = jnp.maximum(jnp.einsum('bqd,df->bqf', y, params["w1"][l]), 0.0)
        ff = jnp.einsum('bqf,fd->bqd', ff, params["w2"][l])
        x = _layer_norm_ref(ff + y)
    return x[:, -1, :]


# ---------------- main --------------------------------------------------------
if __name__ == "__main__":
    key = jax.random.PRNGKey(0)
    k_in, k_par = jax.random.split(key)

    enc_inputs = jax.random.randint(k_in, (B, S), 1, SRC_VOCAB + 1)
    enc_inputs = enc_inputs.at[1, -2:].set(0)   # some padding tokens

    params = init_params(k_par)
    out = jax.block_until_ready(encoder_e_forward(params, enc_inputs))
    ref = jax.block_until_ready(encoder_e_reference(params, enc_inputs))

    assert out.shape == (B, D_MODEL)
    assert bool(jnp.all(jnp.isfinite(out)))
    assert bool(jnp.allclose(out, ref, atol=2e-2, rtol=2e-2)), \
        f"max abs err {float(jnp.max(jnp.abs(out - ref)))}"
    print("KERNEL_OK")
</pallas_src>

<mosaic_0001>
module attributes {stable_mosaic.version = 11 : i64} {
  func.func @encoder_stack_kernel(%arg0: memref<16x1xi32, #tpu.memory_space<vmem>>, %arg1: memref<1x16xi32, #tpu.memory_space<vmem>>, %arg2: memref<17x32xf32, #tpu.memory_space<vmem>>, %arg3: memref<16x32xf32, #tpu.memory_space<vmem>>, %arg4: memref<2x4x32x8xf32, #tpu.memory_space<vmem>>, %arg5: memref<2x4x32x8xf32, #tpu.memory_space<vmem>>, %arg6: memref<2x4x32x8xf32, #tpu.memory_space<vmem>>, %arg7: memref<2x4x8x32xf32, #tpu.memory_space<vmem>>, %arg8: memref<2x32x64xf32, #tpu.memory_space<vmem>>, %arg9: memref<2x64x32xf32, #tpu.memory_space<vmem>>, %arg10: memref<2x32xf32, #tpu.memory_space<vmem>>) attributes {dimension_semantics = [], scalar_prefetch = 0 : i64, scratch_operands = 0 : i64, tpu.core_type = #tpu.core_type<tc>} {
    %c0 = arith.constant 0 : index
    %c0_0 = arith.constant 0 : index
    %0 = vector.load %arg0[%c0, %c0_0] : memref<16x1xi32, #tpu.memory_space<vmem>>, vector<16x1xi32>
    %1 = tpu.iota {dimensions = array<i32: 1>} : vector<16x17xi32>
    %2 = vector.broadcast %0 : vector<16x1xi32> to vector<16x17xi32>
    %3 = arith.cmpi eq, %2, %1 : vector<16x17xi32>
    %4 = arith.extui %3 : vector<16x17xi1> to vector<16x17xi32>
    %5 = arith.sitofp %4 : vector<16x17xi32> to vector<16x17xf32>
    %c0_1 = arith.constant 0 : index
    %c0_2 = arith.constant 0 : index
    %6 = vector.load %arg2[%c0_1, %c0_2] : memref<17x32xf32, #tpu.memory_space<vmem>>, vector<17x32xf32>
    %cst = arith.constant dense<0.000000e+00> : vector<16x32xf32>
    %7 = tpu.matmul %5, %6, %cst {dimension_numbers = #tpu.dot_dimension_numbers<[1], [0], [0], [1], [0, 0, 1, 1], [], []>} : vector<16x17xf32>, vector<17x32xf32>, vector<16x32xf32> -> vector<16x32xf32>
    %c0_3 = arith.constant 0 : index
    %c0_4 = arith.constant 0 : index
    %8 = vector.load %arg3[%c0_3, %c0_4] : memref<16x32xf32, #tpu.memory_space<vmem>>, vector<16x32xf32>
    %9 = arith.addf %7, %8 : vector<16x32xf32>
    %10 = tpu.iota {dimensions = array<i32: 0>} : vector<16x16xi32>
    %11 = tpu.iota {dimensions = array<i32: 1>} : vector<16x16xi32>
    %c3_i32 = arith.constant 3 : i32
    %12 = vector.broadcast %c3_i32 : i32 to vector<16x16xi32>
    %13 = arith.shrsi %10, %12 : vector<16x16xi32>
    %c3_i32_5 = arith.constant 3 : i32
    %14 = vector.broadcast %c3_i32_5 : i32 to vector<16x16xi32>
    %15 = arith.shrsi %11, %14 : vector<16x16xi32>
    %c7_i32 = arith.constant 7 : i32
    %16 = vector.broadcast %c7_i32 : i32 to vector<16x16xi32>
    %17 = arith.andi %10, %16 : vector<16x16xi32>
    %c7_i32_6 = arith.constant 7 : i32
    %18 = vector.broadcast %c7_i32_6 : i32 to vector<16x16xi32>
    %19 = arith.andi %11, %18 : vector<16x16xi32>
    %c0_7 = arith.constant 0 : index
    %c0_8 = arith.constant 0 : index
    %20 = vector.load %arg1[%c0_7, %c0_8] : memref<1x16xi32, #tpu.memory_space<vmem>>, vector<1x16xi32>
    %c0_i32 = arith.constant 0 : i32
    %21 = vector.broadcast %c0_i32 : i32 to vector<1x16xi32>
    %22 = arith.cmpi ne, %20, %21 : vector<1x16xi32>
    %23 = arith.cmpi eq, %13, %15 : vector<16x16xi32>
    %24 = arith.cmpi sle, %19, %17 : vector<16x16xi32>
    %25 = arith.andi %23, %24 : vector<16x16xi1>
    %26 = vector.broadcast %22 : vector<1x16xi1> to vector<16x16xi1>
    %27 = arith.andi %25, %26 : vector<16x16xi1>
    %cst_9 = arith.constant 0.000000e+00 : f32
    %cst_10 = arith.constant -1.000000e+09 : f32
    %28 = vector.broadcast %cst_9 : f32 to vector<16x16xf32>
    %29 = vector.broadcast %cst_10 : f32 to vector<16x16xf32>
    %30 = arith.select %27, %28, %29 : vector<16x16xi1>, vector<16x16xf32>
    %c0_11 = arith.constant 0 : index
    %c0_12 = arith.constant 0 : index
    %c0_13 = arith.constant 0 : index
    %c0_14 = arith.constant 0 : index
    %31 = vector.load %arg4[%c0_11, %c0_12, %c0_13, %c0_14] : memref<2x4x32x8xf32, #tpu.memory_space<vmem>>, vector<1x4x32x8xf32>
    %32 = vector.shape_cast %31 : vector<1x4x32x8xf32> to vector<4x32x8xf32>
    %c0_15 = arith.constant 0 : index
    %c0_16 = arith.constant 0 : index
    %c0_17 = arith.constant 0 : index
    %c0_18 = arith.constant 0 : index
    %33 = vector.load %arg5[%c0_15, %c0_16, %c0_17, %c0_18] : memref<2x4x32x8xf32, #tpu.memory_space<vmem>>, vector<1x4x32x8xf32>
    %34 = vector.shape_cast %33 : vector<1x4x32x8xf32> to vector<4x32x8xf32>
    %c0_19 = arith.constant 0 : index
    %c0_20 = arith.constant 0 : index
    %c0_21 = arith.constant 0 : index
    %c0_22 = arith.constant 0 : index
    %35 = vector.load %arg6[%c0_19, %c0_20, %c0_21, %c0_22] : memref<2x4x32x8xf32, #tpu.memory_space<vmem>>, vector<1x4x32x8xf32>
    %36 = vector.shape_cast %35 : vector<1x4x32x8xf32> to vector<4x32x8xf32>
    %c0_23 = arith.constant 0 : index
    %c0_24 = arith.constant 0 : index
    %c0_25 = arith.constant 0 : index
    %c0_26 = arith.constant 0 : index
    %37 = vector.load %arg7[%c0_23, %c0_24, %c0_25, %c0_26] : memref<2x4x8x32xf32, #tpu.memory_space<vmem>>, vector<1x4x8x32xf32>
    %38 = vector.shape_cast %37 : vector<1x4x8x32xf32> to vector<4x8x32xf32>
    %39 = vector.extract_strided_slice %32 {offsets = [0, 0, 0], sizes = [1, 32, 8], strides = [1, 1, 1]} : vector<4x32x8xf32> to vector<1x32x8xf32>
    %40 = vector.shape_cast %39 : vector<1x32x8xf32> to vector<32x8xf32>
    %cst_27 = arith.constant dense<0.000000e+00> : vector<16x8xf32>
    %41 = tpu.matmul %9, %40, %cst_27 {dimension_numbers = #tpu.dot_dimension_numbers<[1], [0], [0], [1], [0, 0, 1, 1], [], []>} : vector<16x32xf32>, vector<32x8xf32>, vector<16x8xf32> -> vector<16x8xf32>
    %42 = vector.extract_strided_slice %34 {offsets = [0, 0, 0], sizes = [1, 32, 8], strides = [1, 1, 1]} : vector<4x32x8xf32> to vector<1x32x8xf32>
    %43 = vector.shape_cast %42 : vector<1x32x8xf32> to vector<32x8xf32>
    %cst_28 = arith.constant dense<0.000000e+00> : vector<16x8xf32>
    %44 = tpu.matmul %9, %43, %cst_28 {dimension_numbers = #tpu.dot_dimension_numbers<[1], [0], [0], [1], [0, 0, 1, 1], [], []>} : vector<16x32xf32>, vector<32x8xf32>, vector<16x8xf32> -> vector<16x8xf32>
    %45 = vector.extract_strided_slice %36 {offsets = [0, 0, 0], sizes = [1, 32, 8], strides = [1, 1, 1]} : vector<4x32x8xf32> to vector<1x32x8xf32>
    %46 = vector.shape_cast %45 : vector<1x32x8xf32> to vector<32x8xf32>
    %cst_29 = arith.constant dense<0.000000e+00> : vector<16x8xf32>
    %47 = tpu.matmul %9, %46, %cst_29 {dimension_numbers = #tpu.dot_dimension_numbers<[1], [0], [0], [1], [0, 0, 1, 1], [], []>} : vector<16x32xf32>, vector<32x8xf32>, vector<16x8xf32> -> vector<16x8xf32>
    "tpu.trace_start"() <{level = 10 : i32, message = "qd,kd->qk"}> : () -> ()
    %cst_30 = arith.constant dense<0.000000e+00> : vector<16x16xf32>
    %48 = tpu.matmul %41, %44, %cst_30 {dimension_numbers = #tpu.dot_dimension_numbers<[1], [1], [0], [0], [0, 0, 1, 0], [], []>} : vector<16x8xf32>, vector<16x8xf32>, vector<16x16xf32> -> vector<16x16xf32>
    "tpu.trace_stop"() : () -> ()
    %cst_31 = arith.constant 0.353553385 : f32
    %49 = vector.broadcast %cst_31 : f32 to vector<16x16xf32>
    %50 = arith.mulf %48, %49 : vector<16x16xf32>
    %51 = arith.addf %50, %30 : vector<16x16xf32>
    %cst_32 = arith.constant dense<0xFF800000> : vector<16xf32>
    %52 = vector.multi_reduction <maximumf>, %51, %cst_32 [1] : vector<16x16xf32> to vector<16xf32>
    %53 = vector.shape_cast %52 : vector<16xf32> to vector<16x1xf32>
    %54 = vector.broadcast %53 : vector<16x1xf32> to vector<16x16xf32>
    %55 = arith.subf %51, %54 : vector<16x16xf32>
    %56 = math.exp %55 : vector<16x16xf32>
    %cst_33 = arith.constant dense<0.000000e+00> : vector<16xf32>
    %57 = vector.multi_reduction <add>, %56, %cst_33 [1] : vector<16x16xf32> to vector<16xf32>
    %58 = vector.shape_cast %57 : vector<16xf32> to vector<16x1xf32>
    %59 = tpu.reciprocal %58 {approx = true} : vector<16x1xf32> -> vector<16x1xf32>
    %60 = vector.broadcast %59 : vector<16x1xf32> to vector<16x16xf32>
    %61 = arith.mulf %56, %60 : vector<16x16xf32>
    %cst_34 = arith.constant dense<0.000000e+00> : vector<16x8xf32>
    %62 = tpu.matmul %61, %47, %cst_34 {dimension_numbers = #tpu.dot_dimension_numbers<[1], [0], [0], [1], [0, 0, 1, 1], [], []>} : vector<16x16xf32>, vector<16x8xf32>, vector<16x8xf32> -> vector<16x8xf32>
    %63 = vector.extract_strided_slice %38 {offsets = [0, 0, 0], sizes = [1, 8, 32], strides = [1, 1, 1]} : vector<4x8x32xf32> to vector<1x8x32xf32>
    %64 = vector.shape_cast %63 : vector<1x8x32xf32> to vector<8x32xf32>
    %cst_35 = arith.constant dense<0.000000e+00> : vector<16x32xf32>
    %65 = tpu.matmul %62, %64, %cst_35 {dimension_numbers = #tpu.dot_dimension_numbers<[1], [0], [0], [1], [0, 0, 1, 1], [], []>} : vector<16x8xf32>, vector<8x32xf32>, vector<16x32xf32> -> vector<16x32xf32>
    %66 = arith.addf %9, %65 : vector<16x32xf32>
    %67 = vector.extract_strided_slice %32 {offsets = [1, 0, 0], sizes = [1, 32, 8], strides = [1, 1, 1]} : vector<4x32x8xf32> to vector<1x32x8xf32>
    %68 = vector.shape_cast %67 : vector<1x32x8xf32> to vector<32x8xf32>
    %cst_36 = arith.constant dense<0.000000e+00> : vector<16x8xf32>
    %69 = tpu.matmul %9, %68, %cst_36 {dimension_numbers = #tpu.dot_dimension_numbers<[1], [0], [0], [1], [0, 0, 1, 1], [], []>} : vector<16x32xf32>, vector<32x8xf32>, vector<16x8xf32> -> vector<16x8xf32>
    %70 = vector.extract_strided_slice %34 {offsets = [1, 0, 0], sizes = [1, 32, 8], strides = [1, 1, 1]} : vector<4x32x8xf32> to vector<1x32x8xf32>
    %71 = vector.shape_cast %70 : vector<1x32x8xf32> to vector<32x8xf32>
    %cst_37 = arith.constant dense<0.000000e+00> : vector<16x8xf32>
    %72 = tpu.matmul %9, %71, %cst_37 {dimension_numbers = #tpu.dot_dimension_numbers<[1], [0], [0], [1], [0, 0, 1, 1], [], []>} : vector<16x32xf32>, vector<32x8xf32>, vector<16x8xf32> -> vector<16x8xf32>
    %73 = vector.extract_strided_slice %36 {offsets = [1, 0, 0], sizes = [1, 32, 8], strides = [1, 1, 1]} : vector<4x32x8xf32> to vector<1x32x8xf32>
    %74 = vector.shape_cast %73 : vector<1x32x8xf32> to vector<32x8xf32>
    %cst_38 = arith.constant dense<0.000000e+00> : vector<16x8xf32>
    %75 = tpu.matmul %9, %74, %cst_38 {dimension_numbers = #tpu.dot_dimension_numbers<[1], [0], [0], [1], [0, 0, 1, 1], [], []>} : vector<16x32xf32>, vector<32x8xf32>, vector<16x8xf32> -> vector<16x8xf32>
    "tpu.trace_start"() <{level = 10 : i32, message = "qd,kd->qk"}> : () -> ()
    %cst_39 = arith.constant dense<0.000000e+00> : vector<16x16xf32>
    %76 = tpu.matmul %69, %72, %cst_39 {dimension_numbers = #tpu.dot_dimension_numbers<[1], [1], [0], [0], [0, 0, 1, 0], [], []>} : vector<16x8xf32>, vector<16x8xf32>, vector<16x16xf32> -> vector<16x16xf32>
    "tpu.trace_stop"() : () -> ()
    %cst_40 = arith.constant 0.353553385 : f32
    %77 = vector.broadcast %cst_40 : f32 to vector<16x16xf32>
    %78 = arith.mulf %76, %77 : vector<16x16xf32>
    %79 = arith.addf %78, %30 : vector<16x16xf32>
    %cst_41 = arith.constant dense<0xFF800000> : vector<16xf32>
    %80 = vector.multi_reduction <maximumf>, %79, %cst_41 [1] : vector<16x16xf32> to vector<16xf32>
    %81 = vector.shape_cast %80 : vector<16xf32> to vector<16x1xf32>
    %82 = vector.broadcast %81 : vector<16x1xf32> to vector<16x16xf32>
    %83 = arith.subf %79, %82 : vector<16x16xf32>
    %84 = math.exp %83 : vector<16x16xf32>
    %cst_42 = arith.constant dense<0.000000e+00> : vector<16xf32>
    %85 = vector.multi_reduction <add>, %84, %cst_42 [1] : vector<16x16xf32> to vector<16xf32>
    %86 = vector.shape_cast %85 : vector<16xf32> to vector<16x1xf32>
    %87 = tpu.reciprocal %86 {approx = true} : vector<16x1xf32> -> vector<16x1xf32>
    %88 = vector.broadcast %87 : vector<16x1xf32> to vector<16x16xf32>
    %89 = arith.mulf %84, %88 : vector<16x16xf32>
    %cst_43 = arith.constant dense<0.000000e+00> : vector<16x8xf32>
    %90 = tpu.matmul %89, %75, %cst_43 {dimension_numbers = #tpu.dot_dimension_numbers<[1], [0], [0], [1], [0, 0, 1, 1], [], []>} : vector<16x16xf32>, vector<16x8xf32>, vector<16x8xf32> -> vector<16x8xf32>
    %91 = vector.extract_strided_slice %38 {offsets = [1, 0, 0], sizes = [1, 8, 32], strides = [1, 1, 1]} : vector<4x8x32xf32> to vector<1x8x32xf32>
    %92 = vector.shape_cast %91 : vector<1x8x32xf32> to vector<8x32xf32>
    %cst_44 = arith.constant dense<0.000000e+00> : vector<16x32xf32>
    %93 = tpu.matmul %90, %92, %cst_44 {dimension_numbers = #tpu.dot_dimension_numbers<[1], [0], [0], [1], [0, 0, 1, 1], [], []>} : vector<16x8xf32>, vector<8x32xf32>, vector<16x32xf32> -> vector<16x32xf32>
    %94 = arith.addf %66, %93 : vector<16x32xf32>
    %95 = vector.extract_strided_slice %32 {offsets = [2, 0, 0], sizes = [1, 32, 8], strides = [1, 1, 1]} : vector<4x32x8xf32> to vector<1x32x8xf32>
    %96 = vector.shape_cast %95 : vector<1x32x8xf32> to vector<32x8xf32>
    %cst_45 = arith.constant dense<0.000000e+00> : vector<16x8xf32>
    %97 = tpu.matmul %9, %96, %cst_45 {dimension_numbers = #tpu.dot_dimension_numbers<[1], [0], [0], [1], [0, 0, 1, 1], [], []>} : vector<16x32xf32>, vector<32x8xf32>, vector<16x8xf32> -> vector<16x8xf32>
    %98 = vector.extract_strided_slice %34 {offsets = [2, 0, 0], sizes = [1, 32, 8], strides = [1, 1, 1]} : vector<4x32x8xf32> to vector<1x32x8xf32>
    %99 = vector.shape_cast %98 : vector<1x32x8xf32> to vector<32x8xf32>
    %cst_46 = arith.constant dense<0.000000e+00> : vector<16x8xf32>
    %100 = tpu.matmul %9, %99, %cst_46 {dimension_numbers = #tpu.dot_dimension_numbers<[1], [0], [0], [1], [0, 0, 1, 1], [], []>} : vector<16x32xf32>, vector<32x8xf32>, vector<16x8xf32> -> vector<16x8xf32>
    %101 = vector.extract_strided_slice %36 {offsets = [2, 0, 0], sizes = [1, 32, 8], strides = [1, 1, 1]} : vector<4x32x8xf32> to vector<1x32x8xf32>
    %102 = vector.shape_cast %101 : vector<1x32x8xf32> to vector<32x8xf32>
    %cst_47 = arith.constant dense<0.000000e+00> : vector<16x8xf32>
    %103 = tpu.matmul %9, %102, %cst_47 {dimension_numbers = #tpu.dot_dimension_numbers<[1], [0], [0], [1], [0, 0, 1, 1], [], []>} : vector<16x32xf32>, vector<32x8xf32>, vector<16x8xf32> -> vector<16x8xf32>
    "tpu.trace_start"() <{level = 10 : i32, message = "qd,kd->qk"}> : () -> ()
    %cst_48 = arith.constant dense<0.000000e+00> : vector<16x16xf32>
    %104 = tpu.matmul %97, %100, %cst_48 {dimension_numbers = #tpu.dot_dimension_numbers<[1], [1], [0], [0], [0, 0, 1, 0], [], []>} : vector<16x8xf32>, vector<16x8xf32>, vector<16x16xf32> -> vector<16x16xf32>
    "tpu.trace_stop"() : () -> ()
    %cst_49 = arith.constant 0.353553385 : f32
    %105 = vector.broadcast %cst_49 : f32 to vector<16x16xf32>
    %106 = arith.mulf %104, %105 : vector<16x16xf32>
    %107 = arith.addf %106, %30 : vector<16x16xf32>
    %cst_50 = arith.constant dense<0xFF800000> : vector<16xf32>
    %108 = vector.multi_reduction <maximumf>, %107, %cst_50 [1] : vector<16x16xf32> to vector<16xf32>
    %109 = vector.shape_cast %108 : vector<16xf32> to vector<16x1xf32>
    %110 = vector.broadcast %109 : vector<16x1xf32> to vector<16x16xf32>
    %111 = arith.subf %107, %110 : vector<16x16xf32>
    %112 = math.exp %111 : vector<16x16xf32>
    %cst_51 = arith.constant dense<0.000000e+00> : vector<16xf32>
    %113 = vector.multi_reduction <add>, %112, %cst_51 [1] : vector<16x16xf32> to vector<16xf32>
    %114 = vector.shape_cast %113 : vector<16xf32> to vector<16x1xf32>
    %115 = tpu.reciprocal %114 {approx = true} : vector<16x1xf32> -> vector<16x1xf32>
    %116 = vector.broadcast %115 : vector<16x1xf32> to vector<16x16xf32>
    %117 = arith.mulf %112, %116 : vector<16x16xf32>
    %cst_52 = arith.constant dense<0.000000e+00> : vector<16x8xf32>
    %118 = tpu.matmul %117, %103, %cst_52 {dimension_numbers = #tpu.dot_dimension_numbers<[1], [0], [0], [1], [0, 0, 1, 1], [], []>} : vector<16x16xf32>, vector<16x8xf32>, vector<16x8xf32> -> vector<16x8xf32>
    %119 = vector.extract_strided_slice %38 {offsets = [2, 0, 0], sizes = [1, 8, 32], strides = [1, 1, 1]} : vector<4x8x32xf32> to vector<1x8x32xf32>
    %120 = vector.shape_cast %119 : vector<1x8x32xf32> to vector<8x32xf32>
    %cst_53 = arith.constant dense<0.000000e+00> : vector<16x32xf32>
    %121 = tpu.matmul %118, %120, %cst_53 {dimension_numbers = #tpu.dot_dimension_numbers<[1], [0], [0], [1], [0, 0, 1, 1], [], []>} : vector<16x8xf32>, vector<8x32xf32>, vector<16x32xf32> -> vector<16x32xf32>
    %122 = arith.addf %94, %121 : vector<16x32xf32>
    %123 = vector.extract_strided_slice %32 {offsets = [3, 0, 0], sizes = [1, 32, 8], strides = [1, 1, 1]} : vector<4x32x8xf32> to vector<1x32x8xf32>
    %124 = vector.shape_cast %123 : vector<1x32x8xf32> to vector<32x8xf32>
    %cst_54 = arith.constant dense<0.000000e+00> : vector<16x8xf32>
    %125 = tpu.matmul %9, %124, %cst_54 {dimension_numbers = #tpu.dot_dimension_numbers<[1], [0], [0], [1], [0, 0, 1, 1], [], []>} : vector<16x32xf32>, vector<32x8xf32>, vector<16x8xf32> -> vector<16x8xf32>
    %126 = vector.extract_strided_slice %34 {offsets = [3, 0, 0], sizes = [1, 32, 8], strides = [1, 1, 1]} : vector<4x32x8xf32> to vector<1x32x8xf32>
    %127 = vector.shape_cast %126 : vector<1x32x8xf32> to vector<32x8xf32>
    %cst_55 = arith.constant dense<0.000000e+00> : vector<16x8xf32>
    %128 = tpu.matmul %9, %127, %cst_55 {dimension_numbers = #tpu.dot_dimension_numbers<[1], [0], [0], [1], [0, 0, 1, 1], [], []>} : vector<16x32xf32>, vector<32x8xf32>, vector<16x8xf32> -> vector<16x8xf32>
    %129 = vector.extract_strided_slice %36 {offsets = [3, 0, 0], sizes = [1, 32, 8], strides = [1, 1, 1]} : vector<4x32x8xf32> to vector<1x32x8xf32>
    %130 = vector.shape_cast %129 : vector<1x32x8xf32> to vector<32x8xf32>
    %cst_56 = arith.constant dense<0.000000e+00> : vector<16x8xf32>
    %131 = tpu.matmul %9, %130, %cst_56 {dimension_numbers = #tpu.dot_dimension_numbers<[1], [0], [0], [1], [0, 0, 1, 1], [], []>} : vector<16x32xf32>, vector<32x8xf32>, vector<16x8xf32> -> vector<16x8xf32>
    "tpu.trace_start"() <{level = 10 : i32, message = "qd,kd->qk"}> : () -> ()
    %cst_57 = arith.constant dense<0.000000e+00> : vector<16x16xf32>
    %132 = tpu.matmul %125, %128, %cst_57 {dimension_numbers = #tpu.dot_dimension_numbers<[1], [1], [0], [0], [0, 0, 1, 0], [], []>} : vector<16x8xf32>, vector<16x8xf32>, vector<16x16xf32> -> vector<16x16xf32>
    "tpu.trace_stop"() : () -> ()
    %cst_58 = arith.constant 0.353553385 : f32
    %133 = vector.broadcast %cst_58 : f32 to vector<16x16xf32>
    %134 = arith.mulf %132, %133 : vector<16x16xf32>
    %135 = arith.addf %134, %30 : vector<16x16xf32>
    %cst_59 = arith.constant dense<0xFF800000> : vector<16xf32>
    %136 = vector.multi_reduction <maximumf>, %135, %cst_59 [1] : vector<16x16xf32> to vector<16xf32>
    %137 = vector.shape_cast %136 : vector<16xf32> to vector<16x1xf32>
    %138 = vector.broadcast %137 : vector<16x1xf32> to vector<16x16xf32>
    %139 = arith.subf %135, %138 : vector<16x16xf32>
    %140 = math.exp %139 : vector<16x16xf32>
    %cst_60 = arith.constant dense<0.000000e+00> : vector<16xf32>
    %141 = vector.multi_reduction <add>, %140, %cst_60 [1] : vector<16x16xf32> to vector<16xf32>
    %142 = vector.shape_cast %141 : vector<16xf32> to vector<16x1xf32>
    %143 = tpu.reciprocal %142 {approx = true} : vector<16x1xf32> -> vector<16x1xf32>
    %144 = vector.broadcast %143 : vector<16x1xf32> to vector<16x16xf32>
    %145 = arith.mulf %140, %144 : vector<16x16xf32>
    %cst_61 = arith.constant dense<0.000000e+00> : vector<16x8xf32>
    %146 = tpu.matmul %145, %131, %cst_61 {dimension_numbers = #tpu.dot_dimension_numbers<[1], [0], [0], [1], [0, 0, 1, 1], [], []>} : vector<16x16xf32>, vector<16x8xf32>, vector<16x8xf32> -> vector<16x8xf32>
    %147 = vector.extract_strided_slice %38 {offsets = [3, 0, 0], sizes = [1, 8, 32], strides = [1, 1, 1]} : vector<4x8x32xf32> to vector<1x8x32xf32>
    %148 = vector.shape_cast %147 : vector<1x8x32xf32> to vector<8x32xf32>
    %cst_62 = arith.constant dense<0.000000e+00> : vector<16x32xf32>
    %149 = tpu.matmul %146, %148, %cst_62 {dimension_numbers = #tpu.dot_dimension_numbers<[1], [0], [0], [1], [0, 0, 1, 1], [], []>} : vector<16x8xf32>, vector<8x32xf32>, vector<16x32xf32> -> vector<16x32xf32>
    %150 = arith.addf %122, %149 : vector<16x32xf32>
    %cst_63 = arith.constant dense<0.000000e+00> : vector<16xf32>
    %151 = vector.multi_reduction <add>, %150, %cst_63 [1] : vector<16x32xf32> to vector<16xf32>
    %152 = vector.shape_cast %151 : vector<16xf32> to vector<16x1xf32>
    %cst_64 = arith.constant 3.125000e-02 : f32
    %153 = vector.broadcast %cst_64 : f32 to vector<16x1xf32>
    %154 = arith.mulf %152, %153 : vector<16x1xf32>
    %155 = arith.mulf %150, %150 : vector<16x32xf32>
    %cst_65 = arith.constant dense<0.000000e+00> : vector<16xf32>
    %156 = vector.multi_reduction <add>, %155, %cst_65 [1] : vector<16x32xf32> to vector<16xf32>
    %157 = vector.shape_cast %156 : vector<16xf32> to vector<16x1xf32>
    %cst_66 = arith.constant 3.125000e-02 : f32
    %158 = vector.broadcast %cst_66 : f32 to vector<16x1xf32>
    %159 = arith.mulf %157, %158 : vector<16x1xf32>
    %160 = arith.mulf %154, %154 : vector<16x1xf32>
    %161 = arith.subf %159, %160 : vector<16x1xf32>
    %162 = vector.broadcast %154 : vector<16x1xf32> to vector<16x32xf32>
    %163 = arith.subf %150, %162 : vector<16x32xf32>
    %cst_67 = arith.constant 9.99999974E-6 : f32
    %164 = vector.broadcast %cst_67 : f32 to vector<16x1xf32>
    %165 = arith.addf %161, %164 : vector<16x1xf32>
    %166 = math.rsqrt %165 : vector<16x1xf32>
    %167 = vector.broadcast %166 : vector<16x1xf32> to vector<16x32xf32>
    %168 = arith.mulf %163, %167 : vector<16x32xf32>
    %c0_68 = arith.constant 0 : index
    %c0_69 = arith.constant 0 : index
    %c0_70 = arith.constant 0 : index
    %169 = vector.load %arg8[%c0_68, %c0_69, %c0_70] : memref<2x32x64xf32, #tpu.memory_space<vmem>>, vector<1x32x64xf32>
    %170 = vector.shape_cast %169 : vector<1x32x64xf32> to vector<32x64xf32>
    %cst_71 = arith.constant dense<0.000000e+00> : vector<16x64xf32>
    %171 = tpu.matmul %168, %170, %cst_71 {dimension_numbers = #tpu.dot_dimension_numbers<[1], [0], [0], [1], [0, 0, 1, 1], [], []>} : vector<16x32xf32>, vector<32x64xf32>, vector<16x64xf32> -> vector<16x64xf32>
    %cst_72 = arith.constant 0.000000e+00 : f32
    %172 = vector.broadcast %cst_72 : f32 to vector<16x64xf32>
    %173 = arith.maximumf %171, %172 : vector<16x64xf32>
    %c0_73 = arith.constant 0 : index
    %c0_74 = arith.constant 0 : index
    %c0_75 = arith.constant 0 : index
    %174 = vector.load %arg9[%c0_73, %c0_74, %c0_75] : memref<2x64x32xf32, #tpu.memory_space<vmem>>, vector<1x64x32xf32>
    %175 = vector.shape_cast %174 : vector<1x64x32xf32> to vector<64x32xf32>
    %cst_76 = arith.constant dense<0.000000e+00> : vector<16x32xf32>
    %176 = tpu.matmul %173, %175, %cst_76 {dimension_numbers = #tpu.dot_dimension_numbers<[1], [0], [0], [1], [0, 0, 1, 1], [], []>} : vector<16x64xf32>, vector<64x32xf32>, vector<16x32xf32> -> vector<16x32xf32>
    %177 = arith.addf %176, %168 : vector<16x32xf32>
    %cst_77 = arith.constant dense<0.000000e+00> : vector<16xf32>
    %178 = vector.multi_reduction <add>, %177, %cst_77 [1] : vector<16x32xf32> to vector<16xf32>
    %179 = vector.shape_cast %178 : vector<16xf32> to vector<16x1xf32>
    %cst_78 = arith.constant 3.125000e-02 : f32
    %180 = vector.broadcast %cst_78 : f32 to vector<16x1xf32>
    %181 = arith.mulf %179, %180 : vector<16x1xf32>
    %182 = arith.mulf %177, %177 : vector<16x32xf32>
    %cst_79 = arith.constant dense<0.000000e+00> : vector<16xf32>
    %183 = vector.multi_reduction <add>, %182, %cst_79 [1] : vector<16x32xf32> to vector<16xf32>
    %184 = vector.shape_cast %183 : vector<16xf32> to vector<16x1xf32>
    %cst_80 = arith.constant 3.125000e-02 : f32
    %185 = vector.broadcast %cst_80 : f32 to vector<16x1xf32>
    %186 = arith.mulf %184, %185 : vector<16x1xf32>
    %187 = arith.mulf %181, %181 : vector<16x1xf32>
    %188 = arith.subf %186, %187 : vector<16x1xf32>
    %189 = vector.broadcast %181 : vector<16x1xf32> to vector<16x32xf32>
    %190 = arith.subf %177, %189 : vector<16x32xf32>
    %cst_81 = arith.constant 9.99999974E-6 : f32
    %191 = vector.broadcast %cst_81 : f32 to vector<16x1xf32>
    %192 = arith.addf %188, %191 : vector<16x1xf32>
    %193 = math.rsqrt %192 : vector<16x1xf32>
    %194 = vector.broadcast %193 : vector<16x1xf32> to vector<16x32xf32>
    %195 = arith.mulf %190, %194 : vector<16x32xf32>
    %c1 = arith.constant 1 : index
    %c0_82 = arith.constant 0 : index
    %c0_83 = arith.constant 0 : index
    %c0_84 = arith.constant 0 : index
    %196 = vector.load %arg4[%c1, %c0_82, %c0_83, %c0_84] : memref<2x4x32x8xf32, #tpu.memory_space<vmem>>, vector<1x4x32x8xf32>
    %197 = vector.shape_cast %196 : vector<1x4x32x8xf32> to vector<4x32x8xf32>
    %c1_85 = arith.constant 1 : index
    %c0_86 = arith.constant 0 : index
    %c0_87 = arith.constant 0 : index
    %c0_88 = arith.constant 0 : index
    %198 = vector.load %arg5[%c1_85, %c0_86, %c0_87, %c0_88] : memref<2x4x32x8xf32, #tpu.memory_space<vmem>>, vector<1x4x32x8xf32>
    %199 = vector.shape_cast %198 : vector<1x4x32x8xf32> to vector<4x32x8xf32>
    %c1_89 = arith.constant 1 : index
    %c0_90 = arith.constant 0 : index
    %c0_91 = arith.constant 0 : index
    %c0_92 = arith.constant 0 : index
    %200 = vector.load %arg6[%c1_89, %c0_90, %c0_91, %c0_92] : memref<2x4x32x8xf32, #tpu.memory_space<vmem>>, vector<1x4x32x8xf32>
    %201 = vector.shape_cast %200 : vector<1x4x32x8xf32> to vector<4x32x8xf32>
    %c1_93 = arith.constant 1 : index
    %c0_94 = arith.constant 0 : index
    %c0_95 = arith.constant 0 : index
    %c0_96 = arith.constant 0 : index
    %202 = vector.load %arg7[%c1_93, %c0_94, %c0_95, %c0_96] : memref<2x4x8x32xf32, #tpu.memory_space<vmem>>, vector<1x4x8x32xf32>
    %203 = vector.shape_cast %202 : vector<1x4x8x32xf32> to vector<4x8x32xf32>
    %204 = vector.extract_strided_slice %197 {offsets = [0, 0, 0], sizes = [1, 32, 8], strides = [1, 1, 1]} : vector<4x32x8xf32> to vector<1x32x8xf32>
    %205 = vector.shape_cast %204 : vector<1x32x8xf32> to vector<32x8xf32>
    %cst_97 = arith.constant dense<0.000000e+00> : vector<16x8xf32>
    %206 = tpu.matmul %195, %205, %cst_97 {dimension_numbers = #tpu.dot_dimension_numbers<[1], [0], [0], [1], [0, 0, 1, 1], [], []>} : vector<16x32xf32>, vector<32x8xf32>, vector<16x8xf32> -> vector<16x8xf32>
    %207 = vector.extract_strided_slice %199 {offsets = [0, 0, 0], sizes = [1, 32, 8], strides = [1, 1, 1]} : vector<4x32x8xf32> to vector<1x32x8xf32>
    %208 = vector.shape_cast %207 : vector<1x32x8xf32> to vector<32x8xf32>
    %cst_98 = arith.constant dense<0.000000e+00> : vector<16x8xf32>
    %209 = tpu.matmul %195, %208, %cst_98 {dimension_numbers = #tpu.dot_dimension_numbers<[1], [0], [0], [1], [0, 0, 1, 1], [], []>} : vector<16x32xf32>, vector<32x8xf32>, vector<16x8xf32> -> vector<16x8xf32>
    %210 = vector.extract_strided_slice %201 {offsets = [0, 0, 0], sizes = [1, 32, 8], strides = [1, 1, 1]} : vector<4x32x8xf32> to vector<1x32x8xf32>
    %211 = vector.shape_cast %210 : vector<1x32x8xf32> to vector<32x8xf32>
    %cst_99 = arith.constant dense<0.000000e+00> : vector<16x8xf32>
    %212 = tpu.matmul %195, %211, %cst_99 {dimension_numbers = #tpu.dot_dimension_numbers<[1], [0], [0], [1], [0, 0, 1, 1], [], []>} : vector<16x32xf32>, vector<32x8xf32>, vector<16x8xf32> -> vector<16x8xf32>
    "tpu.trace_start"() <{level = 10 : i32, message = "qd,kd->qk"}> : () -> ()
    %cst_100 = arith.constant dense<0.000000e+00> : vector<16x16xf32>
    %213 = tpu.matmul %206, %209, %cst_100 {dimension_numbers = #tpu.dot_dimension_numbers<[1], [1], [0], [0], [0, 0, 1, 0], [], []>} : vector<16x8xf32>, vector<16x8xf32>, vector<16x16xf32> -> vector<16x16xf32>
    "tpu.trace_stop"() : () -> ()
    %cst_101 = arith.constant 0.353553385 : f32
    %214 = vector.broadcast %cst_101 : f32 to vector<16x16xf32>
    %215 = arith.mulf %213, %214 : vector<16x16xf32>
    %216 = arith.addf %215, %30 : vector<16x16xf32>
    %cst_102 = arith.constant dense<0xFF800000> : vector<16xf32>
    %217 = vector.multi_reduction <maximumf>, %216, %cst_102 [1] : vector<16x16xf32> to vector<16xf32>
    %218 = vector.shape_cast %217 : vector<16xf32> to vector<16x1xf32>
    %219 = vector.broadcast %218 : vector<16x1xf32> to vector<16x16xf32>
    %220 = arith.subf %216, %219 : vector<16x16xf32>
    %221 = math.exp %220 : vector<16x16xf32>
    %cst_103 = arith.constant dense<0.000000e+00> : vector<16xf32>
    %222 = vector.multi_reduction <add>, %221, %cst_103 [1] : vector<16x16xf32> to vector<16xf32>
    %223 = vector.shape_cast %222 : vector<16xf32> to vector<16x1xf32>
    %224 = tpu.reciprocal %223 {approx = true} : vector<16x1xf32> -> vector<16x1xf32>
    %225 = vector.broadcast %224 : vector<16x1xf32> to vector<16x16xf32>
    %226 = arith.mulf %221, %225 : vector<16x16xf32>
    %cst_104 = arith.constant dense<0.000000e+00> : vector<16x8xf32>
    %227 = tpu.matmul %226, %212, %cst_104 {dimension_numbers = #tpu.dot_dimension_numbers<[1], [0], [0], [1], [0, 0, 1, 1], [], []>} : vector<16x16xf32>, vector<16x8xf32>, vector<16x8xf32> -> vector<16x8xf32>
    %228 = vector.extract_strided_slice %203 {offsets = [0, 0, 0], sizes = [1, 8, 32], strides = [1, 1, 1]} : vector<4x8x32xf32> to vector<1x8x32xf32>
    %229 = vector.shape_cast %228 : vector<1x8x32xf32> to vector<8x32xf32>
    %cst_105 = arith.constant dense<0.000000e+00> : vector<16x32xf32>
    %230 = tpu.matmul %227, %229, %cst_105 {dimension_numbers = #tpu.dot_dimension_numbers<[1], [0], [0], [1], [0, 0, 1, 1], [], []>} : vector<16x8xf32>, vector<8x32xf32>, vector<16x32xf32> -> vector<16x32xf32>
    %231 = arith.addf %195, %230 : vector<16x32xf32>
    %232 = vector.extract_strided_slice %197 {offsets = [1, 0, 0], sizes = [1, 32, 8], strides = [1, 1, 1]} : vector<4x32x8xf32> to vector<1x32x8xf32>
    %233 = vector.shape_cast %232 : vector<1x32x8xf32> to vector<32x8xf32>
    %cst_106 = arith.constant dense<0.000000e+00> : vector<16x8xf32>
    %234 = tpu.matmul %195, %233, %cst_106 {dimension_numbers = #tpu.dot_dimension_numbers<[1], [0], [0], [1], [0, 0, 1, 1], [], []>} : vector<16x32xf32>, vector<32x8xf32>, vector<16x8xf32> -> vector<16x8xf32>
    %235 = vector.extract_strided_slice %199 {offsets = [1, 0, 0], sizes = [1, 32, 8], strides = [1, 1, 1]} : vector<4x32x8xf32> to vector<1x32x8xf32>
    %236 = vector.shape_cast %235 : vector<1x32x8xf32> to vector<32x8xf32>
    %cst_107 = arith.constant dense<0.000000e+00> : vector<16x8xf32>
    %237 = tpu.matmul %195, %236, %cst_107 {dimension_numbers = #tpu.dot_dimension_numbers<[1], [0], [0], [1], [0, 0, 1, 1], [], []>} : vector<16x32xf32>, vector<32x8xf32>, vector<16x8xf32> -> vector<16x8xf32>
    %238 = vector.extract_strided_slice %201 {offsets = [1, 0, 0], sizes = [1, 32, 8], strides = [1, 1, 1]} : vector<4x32x8xf32> to vector<1x32x8xf32>
    %239 = vector.shape_cast %238 : vector<1x32x8xf32> to vector<32x8xf32>
    %cst_108 = arith.constant dense<0.000000e+00> : vector<16x8xf32>
    %240 = tpu.matmul %195, %239, %cst_108 {dimension_numbers = #tpu.dot_dimension_numbers<[1], [0], [0], [1], [0, 0, 1, 1], [], []>} : vector<16x32xf32>, vector<32x8xf32>, vector<16x8xf32> -> vector<16x8xf32>
    "tpu.trace_start"() <{level = 10 : i32, message = "qd,kd->qk"}> : () -> ()
    %cst_109 = arith.constant dense<0.000000e+00> : vector<16x16xf32>
    %241 = tpu.matmul %234, %237, %cst_109 {dimension_numbers = #tpu.dot_dimension_numbers<[1], [1], [0], [0], [0, 0, 1, 0], [], []>} : vector<16x8xf32>, vector<16x8xf32>, vector<16x16xf32> -> vector<16x16xf32>
    "tpu.trace_stop"() : () -> ()
    %cst_110 = arith.constant 0.353553385 : f32
    %242 = vector.broadcast %cst_110 : f32 to vector<16x16xf32>
    %243 = arith.mulf %241, %242 : vector<16x16xf32>
    %244 = arith.addf %243, %30 : vector<16x16xf32>
    %cst_111 = arith.constant dense<0xFF800000> : vector<16xf32>
    %245 = vector.multi_reduction <maximumf>, %244, %cst_111 [1] : vector<16x16xf32> to vector<16xf32>
    %246 = vector.shape_cast %245 : vector<16xf32> to vector<16x1xf32>
    %247 = vector.broadcast %246 : vector<16x1xf32> to vector<16x16xf32>
    %248 = arith.subf %244, %247 : vector<16x16xf32>
    %249 = math.exp %248 : vector<16x16xf32>
    %cst_112 = arith.constant dense<0.000000e+00> : vector<16xf32>
    %250 = vector.multi_reduction <add>, %249, %cst_112 [1] : vector<16x16xf32> to vector<16xf32>
    %251 = vector.shape_cast %250 : vector<16xf32> to vector<16x1xf32>
    %252 = tpu.reciprocal %251 {approx = true} : vector<16x1xf32> -> vector<16x1xf32>
    %253 = vector.broadcast %252 : vector<16x1xf32> to vector<16x16xf32>
    %254 = arith.mulf %249, %253 : vector<16x16xf32>
    %cst_113 = arith.constant dense<0.000000e+00> : vector<16x8xf32>
    %255 = tpu.matmul %254, %240, %cst_113 {dimension_numbers = #tpu.dot_dimension_numbers<[1], [0], [0], [1], [0, 0, 1, 1], [], []>} : vector<16x16xf32>, vector<16x8xf32>, vector<16x8xf32> -> vector<16x8xf32>
    %256 = vector.extract_strided_slice %203 {offsets = [1, 0, 0], sizes = [1, 8, 32], strides = [1, 1, 1]} : vector<4x8x32xf32> to vector<1x8x32xf32>
    %257 = vector.shape_cast %256 : vector<1x8x32xf32> to vector<8x32xf32>
    %cst_114 = arith.constant dense<0.000000e+00> : vector<16x32xf32>
    %258 = tpu.matmul %255, %257, %cst_114 {dimension_numbers = #tpu.dot_dimension_numbers<[1], [0], [0], [1], [0, 0, 1, 1], [], []>} : vector<16x8xf32>, vector<8x32xf32>, vector<16x32xf32> -> vector<16x32xf32>
    %259 = arith.addf %231, %258 : vector<16x32xf32>
    %260 = vector.extract_strided_slice %197 {offsets = [2, 0, 0], sizes = [1, 32, 8], strides = [1, 1, 1]} : vector<4x32x8xf32> to vector<1x32x8xf32>
    %261 = vector.shape_cast %260 : vector<1x32x8xf32> to vector<32x8xf32>
    %cst_115 = arith.constant dense<0.000000e+00> : vector<16x8xf32>
    %262 = tpu.matmul %195, %261, %cst_115 {dimension_numbers = #tpu.dot_dimension_numbers<[1], [0], [0], [1], [0, 0, 1, 1], [], []>} : vector<16x32xf32>, vector<32x8xf32>, vector<16x8xf32> -> vector<16x8xf32>
    %263 = vector.extract_strided_slice %199 {offsets = [2, 0, 0], sizes = [1, 32, 8], strides = [1, 1, 1]} : vector<4x32x8xf32> to vector<1x32x8xf32>
    %264 = vector.shape_cast %263 : vector<1x32x8xf32> to vector<32x8xf32>
    %cst_116 = arith.constant dense<0.000000e+00> : vector<16x8xf32>
    %265 = tpu.matmul %195, %264, %cst_116 {dimension_numbers = #tpu.dot_dimension_numbers<[1], [0], [0], [1], [0, 0, 1, 1], [], []>} : vector<16x32xf32>, vector<32x8xf32>, vector<16x8xf32> -> vector<16x8xf32>
    %266 = vector.extract_strided_slice %201 {offsets = [2, 0, 0], sizes = [1, 32, 8], strides = [1, 1, 1]} : vector<4x32x8xf32> to vector<1x32x8xf32>
    %267 = vector.shape_cast %266 : vector<1x32x8xf32> to vector<32x8xf32>
    %cst_117 = arith.constant dense<0.000000e+00> : vector<16x8xf32>
    %268 = tpu.matmul %195, %267, %cst_117 {dimension_numbers = #tpu.dot_dimension_numbers<[1], [0], [0], [1], [0, 0, 1, 1], [], []>} : vector<16x32xf32>, vector<32x8xf32>, vector<16x8xf32> -> vector<16x8xf32>
    "tpu.trace_start"() <{level = 10 : i32, message = "qd,kd->qk"}> : () -> ()
    %cst_118 = arith.constant dense<0.000000e+00> : vector<16x16xf32>
    %269 = tpu.matmul %262, %265, %cst_118 {dimension_numbers = #tpu.dot_dimension_numbers<[1], [1], [0], [0], [0, 0, 1, 0], [], []>} : vector<16x8xf32>, vector<16x8xf32>, vector<16x16xf32> -> vector<16x16xf32>
    "tpu.trace_stop"() : () -> ()
    %cst_119 = arith.constant 0.353553385 : f32
    %270 = vector.broadcast %cst_119 : f32 to vector<16x16xf32>
    %271 = arith.mulf %269, %270 : vector<16x16xf32>
    %272 = arith.addf %271, %30 : vector<16x16xf32>
    %cst_120 = arith.constant dense<0xFF800000> : vector<16xf32>
    %273 = vector.multi_reduction <maximumf>, %272, %cst_120 [1] : vector<16x16xf32> to vector<16xf32>
    %274 = vector.shape_cast %273 : vector<16xf32> to vector<16x1xf32>
    %275 = vector.broadcast %274 : vector<16x1xf32> to vector<16x16xf32>
    %276 = arith.subf %272, %275 : vector<16x16xf32>
    %277 = math.exp %276 : vector<16x16xf32>
    %cst_121 = arith.constant dense<0.000000e+00> : vector<16xf32>
    %278 = vector.multi_reduction <add>, %277, %cst_121 [1] : vector<16x16xf32> to vector<16xf32>
    %279 = vector.shape_cast %278 : vector<16xf32> to vector<16x1xf32>
    %280 = tpu.reciprocal %279 {approx = true} : vector<16x1xf32> -> vector<16x1xf32>
    %281 = vector.broadcast %280 : vector<16x1xf32> to vector<16x16xf32>
    %282 = arith.mulf %277, %281 : vector<16x16xf32>
    %cst_122 = arith.constant dense<0.000000e+00> : vector<16x8xf32>
    %283 = tpu.matmul %282, %268, %cst_122 {dimension_numbers = #tpu.dot_dimension_numbers<[1], [0], [0], [1], [0, 0, 1, 1], [], []>} : vector<16x16xf32>, vector<16x8xf32>, vector<16x8xf32> -> vector<16x8xf32>
    %284 = vector.extract_strided_slice %203 {offsets = [2, 0, 0], sizes = [1, 8, 32], strides = [1, 1, 1]} : vector<4x8x32xf32> to vector<1x8x32xf32>
    %285 = vector.shape_cast %284 : vector<1x8x32xf32> to vector<8x32xf32>
    %cst_123 = arith.constant dense<0.000000e+00> : vector<16x32xf32>
    %286 = tpu.matmul %283, %285, %cst_123 {dimension_numbers = #tpu.dot_dimension_numbers<[1], [0], [0], [1], [0, 0, 1, 1], [], []>} : vector<16x8xf32>, vector<8x32xf32>, vector<16x32xf32> -> vector<16x32xf32>
    %287 = arith.addf %259, %286 : vector<16x32xf32>
    %288 = vector.extract_strided_slice %197 {offsets = [3, 0, 0], sizes = [1, 32, 8], strides = [1, 1, 1]} : vector<4x32x8xf32> to vector<1x32x8xf32>
    %289 = vector.shape_cast %288 : vector<1x32x8xf32> to vector<32x8xf32>
    %cst_124 = arith.constant dense<0.000000e+00> : vector<16x8xf32>
    %290 = tpu.matmul %195, %289, %cst_124 {dimension_numbers = #tpu.dot_dimension_numbers<[1], [0], [0], [1], [0, 0, 1, 1], [], []>} : vector<16x32xf32>, vector<32x8xf32>, vector<16x8xf32> -> vector<16x8xf32>
    %291 = vector.extract_strided_slice %199 {offsets = [3, 0, 0], sizes = [1, 32, 8], strides = [1, 1, 1]} : vector<4x32x8xf32> to vector<1x32x8xf32>
    %292 = vector.shape_cast %291 : vector<1x32x8xf32> to vector<32x8xf32>
    %cst_125 = arith.constant dense<0.000000e+00> : vector<16x8xf32>
    %293 = tpu.matmul %195, %292, %cst_125 {dimension_numbers = #tpu.dot_dimension_numbers<[1], [0], [0], [1], [0, 0, 1, 1], [], []>} : vector<16x32xf32>, vector<32x8xf32>, vector<16x8xf32> -> vector<16x8xf32>
    %294 = vector.extract_strided_slice %201 {offsets = [3, 0, 0], sizes = [1, 32, 8], strides = [1, 1, 1]} : vector<4x32x8xf32> to vector<1x32x8xf32>
    %295 = vector.shape_cast %294 : vector<1x32x8xf32> to vector<32x8xf32>
    %cst_126 = arith.constant dense<0.000000e+00> : vector<16x8xf32>
    %296 = tpu.matmul %195, %295, %cst_126 {dimension_numbers = #tpu.dot_dimension_numbers<[1], [0], [0], [1], [0, 0, 1, 1], [], []>} : vector<16x32xf32>, vector<32x8xf32>, vector<16x8xf32> -> vector<16x8xf32>
    "tpu.trace_start"() <{level = 10 : i32, message = "qd,kd->qk"}> : () -> ()
    %cst_127 = arith.constant dense<0.000000e+00> : vector<16x16xf32>
    %297 = tpu.matmul %290, %293, %cst_127 {dimension_numbers = #tpu.dot_dimension_numbers<[1], [1], [0], [0], [0, 0, 1, 0], [], []>} : vector<16x8xf32>, vector<16x8xf32>, vector<16x16xf32> -> vector<16x16xf32>
    "tpu.trace_stop"() : () -> ()
    %cst_128 = arith.constant 0.353553385 : f32
    %298 = vector.broadcast %cst_128 : f32 to vector<16x16xf32>
    %299 = arith.mulf %297, %298 : vector<16x16xf32>
    %300 = arith.addf %299, %30 : vector<16x16xf32>
    %cst_129 = arith.constant dense<0xFF800000> : vector<16xf32>
    %301 = vector.multi_reduction <maximumf>, %300, %cst_129 [1] : vector<16x16xf32> to vector<16xf32>
    %302 = vector.shape_cast %301 : vector<16xf32> to vector<16x1xf32>
    %303 = vector.broadcast %302 : vector<16x1xf32> to vector<16x16xf32>
    %304 = arith.subf %300, %303 : vector<16x16xf32>
    %305 = math.exp %304 : vector<16x16xf32>
    %cst_130 = arith.constant dense<0.000000e+00> : vector<16xf32>
    %306 = vector.multi_reduction <add>, %305, %cst_130 [1] : vector<16x16xf32> to vector<16xf32>
    %307 = vector.shape_cast %306 : vector<16xf32> to vector<16x1xf32>
    %308 = tpu.reciprocal %307 {approx = true} : vector<16x1xf32> -> vector<16x1xf32>
    %309 = vector.broadcast %308 : vector<16x1xf32> to vector<16x16xf32>
    %310 = arith.mulf %305, %309 : vector<16x16xf32>
    %cst_131 = arith.constant dense<0.000000e+00> : vector<16x8xf32>
    %311 = tpu.matmul %310, %296, %cst_131 {dimension_numbers = #tpu.dot_dimension_numbers<[1], [0], [0], [1], [0, 0, 1, 1], [], []>} : vector<16x16xf32>, vector<16x8xf32>, vector<16x8xf32> -> vector<16x8xf32>
    %312 = vector.extract_strided_slice %203 {offsets = [3, 0, 0], sizes = [1, 8, 32], strides = [1, 1, 1]} : vector<4x8x32xf32> to vector<1x8x32xf32>
    %313 = vector.shape_cast %312 : vector<1x8x32xf32> to vector<8x32xf32>
    %cst_132 = arith.constant dense<0.000000e+00> : vector<16x32xf32>
    %314 = tpu.matmul %311, %313, %cst_132 {dimension_numbers = #tpu.dot_dimension_numbers<[1], [0], [0], [1], [0, 0, 1, 1], [], []>} : vector<16x8xf32>, vector<8x32xf32>, vector<16x32xf32> -> vector<16x32xf32>
    %315 = arith.addf %287, %314 : vector<16x32xf32>
    %cst_133 = arith.constant dense<0.000000e+00> : vector<16xf32>
    %316 = vector.multi_reduction <add>, %315, %cst_133 [1] : vector<16x32xf32> to vector<16xf32>
    %317 = vector.shape_cast %316 : vector<16xf32> to vector<16x1xf32>
    %cst_134 = arith.constant 3.125000e-02 : f32
    %318 = vector.broadcast %cst_134 : f32 to vector<16x1xf32>
    %319 = arith.mulf %317, %318 : vector<16x1xf32>
    %320 = arith.mulf %315, %315 : vector<16x32xf32>
    %cst_135 = arith.constant dense<0.000000e+00> : vector<16xf32>
    %321 = vector.multi_reduction <add>, %320, %cst_135 [1] : vector<16x32xf32> to vector<16xf32>
    %322 = vector.shape_cast %321 : vector<16xf32> to vector<16x1xf32>
    %cst_136 = arith.constant 3.125000e-02 : f32
    %323 = vector.broadcast %cst_136 : f32 to vector<16x1xf32>
    %324 = arith.mulf %322, %323 : vector<16x1xf32>
    %325 = arith.mulf %319, %319 : vector<16x1xf32>
    %326 = arith.subf %324, %325 : vector<16x1xf32>
    %327 = vector.broadcast %319 : vector<16x1xf32> to vector<16x32xf32>
    %328 = arith.subf %315, %327 : vector<16x32xf32>
    %cst_137 = arith.constant 9.99999974E-6 : f32
    %329 = vector.broadcast %cst_137 : f32 to vector<16x1xf32>
    %330 = arith.addf %326, %329 : vector<16x1xf32>
    %331 = math.rsqrt %330 : vector<16x1xf32>
    %332 = vector.broadcast %331 : vector<16x1xf32> to vector<16x32xf32>
    %333 = arith.mulf %328, %332 : vector<16x32xf32>
    %c1_138 = arith.constant 1 : index
    %c0_139 = arith.constant 0 : index
    %c0_140 = arith.constant 0 : index
    %334 = vector.load %arg8[%c1_138, %c0_139, %c0_140] : memref<2x32x64xf32, #tpu.memory_space<vmem>>, vector<1x32x64xf32>
    %335 = vector.shape_cast %334 : vector<1x32x64xf32> to vector<32x64xf32>
    %cst_141 = arith.constant dense<0.000000e+00> : vector<16x64xf32>
    %336 = tpu.matmul %333, %335, %cst_141 {dimension_numbers = #tpu.dot_dimension_numbers<[1], [0], [0], [1], [0, 0, 1, 1], [], []>} : vector<16x32xf32>, vector<32x64xf32>, vector<16x64xf32> -> vector<16x64xf32>
    %cst_142 = arith.constant 0.000000e+00 : f32
    %337 = vector.broadcast %cst_142 : f32 to vector<16x64xf32>
    %338 = arith.maximumf %336, %337 : vector<16x64xf32>
    %c1_143 = arith.constant 1 : index
    %c0_144 = arith.constant 0 : index
    %c0_145 = arith.constant 0 : index
    %339 = vector.load %arg9[%c1_143, %c0_144, %c0_145] : memref<2x64x32xf32, #tpu.memory_space<vmem>>, vector<1x64x32xf32>
    %340 = vector.shape_cast %339 : vector<1x64x32xf32> to vector<64x32xf32>
    %cst_146 = arith.constant dense<0.000000e+00> : vector<16x32xf32>
    %341 = tpu.matmul %338, %340, %cst_146 {dimension_numbers = #tpu.dot_dimension_numbers<[1], [0], [0], [1], [0, 0, 1, 1], [], []>} : vector<16x64xf32>, vector<64x32xf32>, vector<16x32xf32> -> vector<16x32xf32>
    %342 = arith.addf %341, %333 : vector<16x32xf32>
    %cst_147 = arith.constant dense<0.000000e+00> : vector<16xf32>
    %343 = vector.multi_reduction <add>, %342, %cst_147 [1] : vector<16x32xf32> to vector<16xf32>
    %344 = vector.shape_cast %343 : vector<16xf32> to vector<16x1xf32>
    %cst_148 = arith.constant 3.125000e-02 : f32
    %345 = vector.broadcast %cst_148 : f32 to vector<16x1xf32>
    %346 = arith.mulf %344, %345 : vector<16x1xf32>
    %347 = arith.mulf %342, %342 : vector<16x32xf32>
    %cst_149 = arith.constant dense<0.000000e+00> : vector<16xf32>
    %348 = vector.multi_reduction <add>, %347, %cst_149 [1] : vector<16x32xf32> to vector<16xf32>
    %349 = vector.shape_cast %348 : vector<16xf32> to vector<16x1xf32>
    %cst_150 = arith.constant 3.125000e-02 : f32
    %350 = vector.broadcast %cst_150 : f32 to vector<16x1xf32>
    %351 = arith.mulf %349, %350 : vector<16x1xf32>
    %352 = arith.mulf %346, %346 : vector<16x1xf32>
    %353 = arith.subf %351, %352 : vector<16x1xf32>
    %354 = vector.broadcast %346 : vector<16x1xf32> to vector<16x32xf32>
    %355 = arith.subf %342, %354 : vector<16x32xf32>
    %cst_151 = arith.constant 9.99999974E-6 : f32
    %356 = vector.broadcast %cst_151 : f32 to vector<16x1xf32>
    %357 = arith.addf %353, %356 : vector<16x1xf32>
    %358 = math.rsqrt %357 : vector<16x1xf32>
    %359 = vector.broadcast %358 : vector<16x1xf32> to vector<16x32xf32>
    %360 = arith.mulf %355, %359 : vector<16x32xf32>
    %361 = vector.extract_strided_slice %360 {offsets = [7, 0], sizes = [1, 32], strides = [1, 1]} : vector<16x32xf32> to vector<1x32xf32>
    %362 = vector.extract_strided_slice %360 {offsets = [15, 0], sizes = [1, 32], strides = [1, 1]} : vector<16x32xf32> to vector<1x32xf32>
    %363 = tpu.concatenate %361, %362 in 0 : vector<1x32xf32>, vector<1x32xf32> -> vector<2x32xf32>
    %c0_152 = arith.constant 0 : index
    %c0_153 = arith.constant 0 : index
    %364 = vector.load %arg10[%c0_152, %c0_153] : memref<2x32xf32, #tpu.memory_space<vmem>>, vector<2x32xf32>
    tpu.vector_store %arg10[%c0_152, %c0_153], %363 {strides = array<i32>} : memref<2x32xf32, #tpu.memory_space<vmem>>, vector<2x32xf32>,
    return
  }
}

</mosaic_0001>

<bundles_post_ra>
// kernel: encoder_e_forward.1
= control target key start
LH: loop header
LB: loop body
LE: loop exit
PB: predicated region body
PF: predicated region fallthrough
CT: control target
= control target key end

     0   :  { %v38_v1 = vlaneseq  ;;  %v6199_v3 = vmov 0   ;;  %s6969_s0 = inlined_call_operand.vmem [shape: s32[16,1], index: 0, kind: input, shape index: {}]   ;;  %s6970_s1 = inlined_call_operand.vmem [shape: s32[1,16], index: 1, kind: input, shape index: {}]   ;;  %s6971_s2 = inlined_call_operand.vmem [shape: f32[17,32], index: 2, kind: input, shape index: {}]   ;;  %s6972_s3 = inlined_call_operand.vmem [shape: f32[16,32], index: 3, kind: input, shape index: {}]   ;;  %s6973_s4 = inlined_call_operand.vmem [shape: f32[2,4,32,8], index: 4, kind: input, shape index: {}]   ;;  %s6974_s5 = inlined_call_operand.vmem [shape: f32[2,4,32,8], index: 5, kind: input, shape index: {}]   ;;  %s6975_s6 = inlined_call_operand.vmem [shape: f32[2,4,32,8], index: 6, kind: input, shape index: {}]   ;;  %s6976_s7 = inlined_call_operand.vmem [shape: f32[2,4,8,32], index: 7, kind: input, shape index: {}]   ;;  %s6977_s8 = inlined_call_operand.vmem [shape: f32[2,32,64], index: 8, kind: input, shape index: {}]   ;;  %s6978_s9 = inlined_call_operand.vmem [shape: f32[2,64,32], index: 9, kind: input, shape index: {}]   ;;  %s6979_s10 = inlined_call_operand.hbm [shape: f32[2,32], index: 10, kind: output, shape index: {}]  }
   0x1   :  { %v152_v0 = vld [vmem:[%s6970_s1] sm:$0x1]  ;;  %6094 = vset.pattern.permute.xlu0 %v6199_v3  ;;  %v53_v5 = vld [vmem:[%s6971_s2 + $0x8] sm:$0xff] }
   0x2   :  { %v36_v2 = vld [vmem:[%s6969_s0] sm:$0xff]  ;;  %vm153_vm0 = vcmp.ne.s32.totalorder %v152_v0, 0  ;;  %v39_v6 = vand.u32 127, %v38_v1  ;;  %v144_v7 = vshrl.u32 %v38_v1, 7 }
   0x3   :  { %v52_v4 = vld [vmem:[%s6971_s2] sm:$0xff]  ;;  %41 = vperm.xlu0 %6094, %v36_v2  }
   0x4   :  { %v5750_v8 = vpack.c.bf16 %v53_v5, %v52_v4 }
   0x5   :  { %15 = vsyncpa [#allocation3], 0  ;;  %v160_v9 = vsel %vm153_vm0, 1, %v6199_v3  ;;  %v37_v10 = vld [vmem:[%s6969_s0 + $0x8] sm:$0xff]  ;;  %v145_v11 = vadd.s32 8, %v144_v7  ;;  %v146_v12 = vshra.s32 %v144_v7, 3 }
   0x6   :  { %v148_v13 = vshra.s32 %v39_v6, 3  ;;  %v149_v14 = vand.u32 7, %v144_v7  ;;  %5751 = vmatprep.subr.bf16.mxu0 %v5750_v8  ;;  %v151_v15 = vand.u32 7, %v39_v6  ;;  %v163_v16 = vsub.s32 0, %v144_v7  ;;  %v54_v17 = vld [vmem:[%s6971_s2 + $0x10] sm:$0x1] }
   0x7   :  { %5753 = vmatpush3.bf16.msra.mxu0 %v5750_v8  ;;  %vm64_vm1 = vcmask 1040384   ;;  %v147_v18 = vshra.s32 %v145_v11, 3  ;;  %v150_v19 = vand.u32 7, %v145_v11  ;;  %44 = vperm.xlu0 %6094, %v37_v10   ;;  %v170_v22 = vld [vmem:[%s6973_s4] sm:$0xff]  ;;  %v171_v23 = vld [vmem:[%s6973_s4 + $0x8] sm:$0xff]  ;;  %vm57_vm11 = vcmask 138240  }
   0x8   :  { %vm6276_vm2 = vcmp.eq.s32.totalorder %v146_v12, %v148_v13  ;;  %5269 = vmatprep.subr.msk.mxu0 %vm64_vm1, %v54_v17  ;;  %vm156_vm3 = vcmp.le.s32.totalorder %v151_v15, %v149_v14  ;;  %v164_v21 = vrot.slane %v160_v9, %v163_v16  ;;  %v5754_v24 = vpack.c.bf16 %v171_v23, %v170_v22  ;;  %v186_v25 = vld [vmem:[%s6974_s5] sm:$0xff]  ;;  %v187_v26 = vld [vmem:[%s6974_s5 + $0x8] sm:$0xff]  ;;  %v172_v35 = vld [vmem:[%s6973_s4 + $0x10] sm:$0xff] }
   0x9   :  { %vm155_vm4 = vcmp.eq.s32.totalorder %v147_v18, %v148_v13  ;;  %vm157_vm5 = vcmp.le.s32.totalorder %v151_v15, %v150_v19  ;;  %vm158_vm6 = vmand %vm6276_vm2, %vm156_vm3  ;;  %v5762_v28 = vpack.c.bf16 %v187_v26, %v186_v25  ;;  %v6200_v31 = vmov 0.0   ;;  %v173_v36 = vld [vmem:[%s6973_s4 + $0x18] sm:$0xff]  ;;  %v188_v38 = vld [vmem:[%s6974_s5 + $0x10] sm:$0xff] }
   0xa   :  { %vm159_vm7 = vmand %vm155_vm4, %vm157_vm5  ;;  %vm165_vm8 = vcmp.eq.s32.totalorder %v164_v21, 1  ;;  %5755 = vmatprep.subr.bf16.mxu1 %v5754_v24  ;;  %v5758_v37 = vpack.c.bf16 %v173_v36, %v172_v35  ;;  %v189_v39 = vld [vmem:[%s6974_s5 + $0x18] sm:$0xff]  ;;  %v202_v41 = vld [vmem:[%s6975_s6] sm:$0xff]  ;;  %vm222_vm14 = vcmask 261120   ;;  %vm454_vm15 = vcmask 64512  }
   0xb   :  { %5270 = vmatpush3.msk.msra.mxu0 %vm64_vm1, %v54_v17  ;;  %vm6296_vm9 = vmand %vm158_vm6, %vm165_vm8  ;;  %5757 = vmatpush3.bf16.msra.mxu1 %v5754_v24  ;;  %v5766_v40 = vpack.c.bf16 %v189_v39, %v188_v38  ;;  %v203_v42 = vld [vmem:[%s6975_s6 + $0x8] sm:$0xff]  ;;  %v55_v44 = vld [vmem:[%s6972_s3] sm:$0xff]  ;;  %v6201_v63 = vmov -1e+09   ;;  %vm546_vm2 = vcmask 130048   ;;  %vm2364_vm3 = vcmask 523264  }
   0xc   :  { %vm6300_vm10 = vmand %vm159_vm7, %vm165_vm8  ;;  %5763 = vmatprep.subr.bf16.mxu0 %v5762_v28  ;;  %5759 = vmatprep.subr.bf16.mxu1 %v5758_v37  ;;  %v5770_v43 = vpack.c.bf16 %v203_v42, %v202_v41  ;;  %v56_v45 = vld [vmem:[%s6972_s3 + $0x8] sm:$0xff]  ;;  %v204_v47 = vld [vmem:[%s6975_s6 + $0x10] sm:$0xff]  ;;  %v6364_v0 = vsel %vm6296_vm9, 0.0, %v6201_v63  ;;  %vm4791_vm4 = vcmask 254976  }
   0xd   :  { %v205_v48 = vld [vmem:[%s6975_s6 + $0x18] sm:$0xff]  ;;  %vm6352_vm0 = vmpackc.low %vm454_vm15, %vm454_vm15  ;;  %v6368_v4 = vsel %vm6300_vm10, 0.0, %v6201_v63  ;;  %v174_v19 = vld [vmem:[%s6973_s4 + $0x20] sm:$0xff] }
   0xe   :  { %v5774_v52 = vpack.c.bf16 %v205_v48, %v204_v47  ;;  %v175_v20 = vld [vmem:[%s6973_s4 + $0x28] sm:$0xff]  ;;  %v218_v22 = vld [vmem:[%s6976_s7] sm:$0xff]  ;;  %v176_v27 = vld [vmem:[%s6973_s4 + $0x30] sm:$0xff] }
   0xf   :  { %5761 = vmatpush3.bf16.msra.mxu1 %v5758_v37  ;;  %v5788_v21 = vpack.c.bf16 %v175_v20, %v174_v19  ;;  %v208_v35 = vld [vmem:[%s6975_s6 + $0x30] sm:$0xff]  ;;  %v209_v36 = vld [vmem:[%s6975_s6 + $0x38] sm:$0xff]  ;;  %v190_v38 = vld [vmem:[%s6974_s5 + $0x20] sm:$0xff] }
  0x10   :  { %5771 = vmatprep.subr.bf16.mxu1 %v5770_v43  ;;  %v5808_v37 = vpack.c.bf16 %v209_v36, %v208_v35  ;;  %v191_v39 = vld [vmem:[%s6974_s5 + $0x28] sm:$0xff]  ;;  %v192_v41 = vld [vmem:[%s6974_s5 + $0x30] sm:$0xff]  ;;  %v193_v42 = vld [vmem:[%s6974_s5 + $0x38] sm:$0xff] }
  0x11   :  { %v196_v35 = vld [vmem:[%s6974_s5 + $0x50] sm:$0xff]  ;;  %v197_v36 = vld [vmem:[%s6974_s5 + $0x58] sm:$0xff] }
  0x82   :  { %v42_v30 = vpop.permute.xlu0 %41 }
  0x83   :  { %vm46_vm12 = vcmp.eq.s32.totalorder %v42_v30, %v39_v6 }
  0x84   :  { %v4807_v32 = vsel %vm46_vm12, 1.0, %v6200_v31 }
  0x85   :  { %5271 = vmatprep.mubr.msk.f32.mxu0 %vm57_vm11, %v4807_v32  ;;  %v206_v32 = vld [vmem:[%s6975_s6 + $0x20] sm:$0xff] }
  0x86   :  { %v45_v33 = vpop.permute.xlu0 %44 }
  0x87   :  { %vm47_vm13 = vcmp.eq.s32.totalorder %v45_v33, %v39_v6  ;;  %v207_v33 = vld [vmem:[%s6975_s6 + $0x28] sm:$0xff] }
  0x88   :  { %v4808_v34 = vsel %vm47_vm13, 1.0, %v6200_v31 }
  0x89   :  { %5272 = vmatmul.mubr.msk.f32.vlgmr.msra.gmra.mrb[0].mxu0 %vm57_vm11, %v4808_v34  ;;  %v5804_v34 = vpack.c.bf16 %v207_v33, %v206_v32  ;;  %v194_v32 = vld [vmem:[%s6974_s5 + $0x40] sm:$0xff]  ;;  %v195_v33 = vld [vmem:[%s6974_s5 + $0x48] sm:$0xff] }
  0x8a   :  { %5765 = vmatpush3.bf16.msra.mxu0 %v5762_v28  ;;  %v177_v28 = vld [vmem:[%s6973_s4 + $0x38] sm:$0xff] }
  0x8b   :  { %5767 = vmatprep.subr.bf16.mxu0 %v5766_v40  ;;  %v5792_v31 = vpack.c.bf16 %v177_v28, %v176_v27  ;;  %v211_v27 = vld [vmem:[%s6975_s6 + $0x48] sm:$0xff] }
  0x8e   :  { %5769 = vmatpush3.bf16.msra.mxu0 %v5766_v40  ;;  %v5796_v40 = vpack.c.bf16 %v191_v39, %v190_v38  ;;  %v5834_v39 = vpack.c.bf16 %v197_v36, %v196_v35 }
 0x15c   :  { %v5273_v46 = vpop.f32.mrb[0].mxu0 }
 0x15d   :  { %v134_v49 = vpop.f32.mrb[1].mxu0  ;;  %v6336_v51 = vadd.f32 %v5273_v46, %v56_v45  ;;  %v5800_v45 = vpack.c.bf16 %v193_v42, %v192_v41 }
 0x15e   :  { %v6334_v50 = vadd.f32 %v134_v49, %v55_v44 }
 0x160   :  { %5282 = vmatprep.mubr.msk.f32.mxu1 %vm222_vm14, %v6334_v50  ;;  %5293 = vmatprep.mubr.msk.f32.mxu0 %vm222_vm14, %v6334_v50 }
 0x161   :  { %5283 = vmatmul.mubr.msk.f32.vlgmr.msra.gmra.mrb[0].mxu1 %vm222_vm14, %v6336_v51  ;;  %5294 = vmatmul.mubr.msk.f32.vlgmr.msra.gmra.mrb[2].mxu0 %vm222_vm14, %v6336_v51 }
 0x162   :  { %5773 = vmatpush3.bf16.msra.mxu1 %v5770_v43  ;;  %5304 = vmatprep.mubr.msk.f32.mxu1 %vm222_vm14, %v6334_v50 }
 0x163   :  { %5775 = vmatprep.subr.bf16.mxu1 %v5774_v52 }
 0x166   :  { %5777 = vmatpush3.bf16.msra.mxu1 %v5774_v52 }
 0x167   :  { %5321 = vmatprep.subr.mxu1 %v218_v22 }
 0x169   :  { %5305 = vmatmul.mubr.msk.f32.vlgmr.msra.gmra.mrb[2].mxu1 %vm222_vm14, %v6336_v51 }
 0x16a   :  { %5322 = vmatpush3.msra.mxu1 %v218_v22  ;;  %v181_v22 = vld [vmem:[%s6973_s4 + $0x58] sm:$0xff] }
 0x16b   :  { %5797 = vmatprep.subr.bf16.mxu1 %v5796_v40 }
 0x234   :  { %v5284_v53 = vpop.f32.mrb[0].mxu1  ;;  %v5295_v54 = vpop.f32.mrb[2].mxu0 }
 0x235   :  { %v295_v55 = vpop.f32.mrb[1].mxu1  ;;  %v370_v56 = vpop.f32.mrb[3].mxu0 }
 0x236   :  { %v5778_v58 = vpack.c.bf16 %v5295_v54, %v370_v56  ;;  %5311 = vmatprep.mubr.msk.f32.mxu0 %vm454_vm15, %v295_v55 }
 0x238   :  { %5780 = vmatprep.subr.msk.bf16.mxu0 %vm6352_vm0, %v5778_v58 }
 0x239   :  { %5783 = vmatpush3.bf16.xpose.msk.msra.mxu0 %vm6352_vm0, %v5778_v58 }
 0x23c   :  { %v5306_v59 = vpop.f32.mrb[2].mxu1 }
 0x23d   :  { %v445_v60 = vpop.f32.mrb[3].mxu1 }
 0x23e   :  { %v5784_v61 = vpack.c.bf16 %v5306_v59, %v445_v60 }
 0x240   :  { %5785 = vmatprep.subr.bf16.mxu0 %v5784_v61  ;;  %5312 = vmatmul.mubr.msk.f32.vlgmr.msra.gmra.mrb[4].mxu0 %vm454_vm15, %v5284_v53 }
 0x241   :  { %5787 = vmatpush3.bf16.msra.mxu0 %v5784_v61 }
 0x242   :  { %5789 = vmatprep.subr.bf16.mxu0 %v5788_v21 }
 0x313   :  { %v5313_v62 = vpop.f32.mrb[4].mxu0 }
 0x314   :  { %v533_v1 = vpop.f32.mrb[5].mxu0  ;;  %v543_v2 = vmul.f32 0.35355338, %v5313_v62 }
 0x315   :  { %v542_v3 = vmul.f32 0.35355338, %v533_v1 }
 0x316   :  { %v545_v7 = vadd.f32 %v543_v2, %v6368_v4 }
 0x317   :  { %v544_v5 = vadd.f32 %v542_v3, %v6364_v0 }
 0x318   :  { %v550_v8 = vsel %vm546_vm2, %v545_v7, -inf }
 0x319   :  { %v547_v6 = vsel %vm546_vm2, %v544_v5, -inf }
 0x31a   :  { %548 = vmax.xlane.f32.xlu1 %v547_v6 }
 0x31e   :  { %551 = vmax.xlane.f32.xlu1 %v550_v8 }
 0x3a7   :  { %v549_v9 = vpop.xlane.xlu1 %548 }
 0x3a8   :  { %v553_v10 = vsub.f32 %v544_v5, %v549_v9 }
 0x3aa   :  { %v555_v11 = vmul.f32 1.442695, %v553_v10 }
 0x3ab   :  { %v552_v12 = vpop.xlane.xlu1 %551 }
 0x3ac   :  { %6095 = vpow2.f32 %v555_v11  ;;  %v554_v13 = vsub.f32 %v545_v7, %v552_v12 }
 0x3ae   :  { %v557_v14 = vmul.f32 1.442695, %v554_v13  ;;  %v178_v13 = vld [vmem:[%s6973_s4 + $0x40] sm:$0xff] }
 0x3b0   :  { %6097 = vpow2.f32 %v557_v14  ;;  %v179_v14 = vld [vmem:[%s6973_s4 + $0x48] sm:$0xff] }
 0x3b6   :  { %v6096_v15 = vpop.eup %6095 }
 0x3b7   :  { %v559_v16 = vsel %vm546_vm2, %v6096_v15, 0.0 }
 0x3b8   :  { %560 = vadd.xlane.f32.xlu0 %v559_v16  ;;  %v219_v16 = vld [vmem:[%s6976_s7 + $0x8] sm:$0xff] }
 0x3ba   :  { %v6098_v17 = vpop.eup %6097 }
 0x3bb   :  { %v562_v18 = vsel %vm546_vm2, %v6098_v17, 0.0 }
 0x3bc   :  { %563 = vadd.xlane.f32.xlu1 %v562_v18 }
 0x445   :  { %v561_v23 = vpop.xlane.xlu0 %560 }
 0x446   :  { %6099 = vrcp.f32 %v561_v23 }
 0x449   :  { %v564_v24 = vpop.xlane.xlu1 %563 }
 0x44a   :  { %6101 = vrcp.f32 %v564_v24 }
 0x450   :  { %v6100_v25 = vpop.eup %6099 }
 0x451   :  { %v567_v26 = vmul.f32 %v6100_v25, %v6096_v15  ;;  %v5822_v15 = vpack.c.bf16 %v179_v14, %v178_v13 }
 0x453   :  { %5318 = vmatprep.mubr.msk.f32.mxu0 %vm546_vm2, %v567_v26  ;;  %v210_v26 = vld [vmem:[%s6975_s6 + $0x40] sm:$0xff] }
 0x454   :  { %v6102_v29 = vpop.eup %6101  ;;  %v5838_v28 = vpack.c.bf16 %v211_v27, %v210_v26  ;;  %v198_v26 = vld [vmem:[%s6974_s5 + $0x60] sm:$0xff]  ;;  %v199_v27 = vld [vmem:[%s6974_s5 + $0x68] sm:$0xff] }
 0x455   :  { %v568_v30 = vmul.f32 %v6102_v29, %v6098_v17  ;;  %v212_v29 = vld [vmem:[%s6975_s6 + $0x50] sm:$0xff] }
 0x457   :  { %5319 = vmatmul.mubr.msk.f32.vlgmr.msra.gmra.mrb[6].mxu0 %vm546_vm2, %v568_v30  ;;  %v213_v30 = vld [vmem:[%s6975_s6 + $0x58] sm:$0xff] }
 0x458   :  { %5791 = vmatpush3.bf16.msra.mxu0 %v5788_v21  ;;  %5334 = vmatprep.mubr.msk.f32.mxu0 %vm222_vm14, %v6334_v50  ;;  %v180_v21 = vld [vmem:[%s6973_s4 + $0x50] sm:$0xff] }
 0x459   :  { %5793 = vmatprep.subr.bf16.mxu0 %v5792_v31  ;;  %v5826_v25 = vpack.c.bf16 %v181_v22, %v180_v21  ;;  %v215_v21 = vld [vmem:[%s6975_s6 + $0x68] sm:$0xff] }
 0x45c   :  { %5795 = vmatpush3.bf16.msra.mxu0 %v5792_v31  ;;  %v5842_v31 = vpack.c.bf16 %v213_v30, %v212_v29  ;;  %v200_v29 = vld [vmem:[%s6974_s5 + $0x70] sm:$0xff]  ;;  %v201_v30 = vld [vmem:[%s6974_s5 + $0x78] sm:$0xff] }
 0x45d   :  { %5805 = vmatprep.subr.bf16.mxu0 %v5804_v34 }
 0x45f   :  { %5335 = vmatmul.mubr.msk.f32.vlgmr.msra.gmra.mrb[8].mxu0 %vm222_vm14, %v6336_v51 }
 0x460   :  { %5807 = vmatpush3.bf16.msra.mxu0 %v5804_v34  ;;  %5356 = vmatprep.mubr.msk.f32.mxu0 %vm222_vm14, %v6334_v50  ;;  %v5830_v34 = vpack.c.bf16 %v195_v33, %v194_v32  ;;  %v5868_v33 = vpack.c.bf16 %v201_v30, %v200_v29  ;;  %v2360_v30 = vld [vmem:[%s6978_s9 + $0x20] sm:$0xff] }
 0x461   :  { %5809 = vmatprep.subr.bf16.mxu0 %v5808_v37 }
 0x464   :  { %5811 = vmatpush3.bf16.msra.mxu0 %v5808_v37 }
 0x467   :  { %5357 = vmatmul.mubr.msk.f32.vlgmr.msra.gmra.mrb[10].mxu0 %vm222_vm14, %v6336_v51 }
 0x52a   :  { %v5320_v43 = vpop.f32.mrb[6].mxu0 }
 0x52b   :  { %v641_v44 = vpop.f32.mrb[7].mxu0 }
 0x52c   :  { %5323 = vmatprep.mubr.msk.f32.mxu1 %vm454_vm15, %v641_v44 }
 0x52d   :  { %5324 = vmatmul.mubr.msk.f32.vlgmr.msra.gmra.mrb[4].mxu1 %vm454_vm15, %v5320_v43 }
 0x52e   :  { %5799 = vmatpush3.bf16.msra.mxu1 %v5796_v40  ;;  %5345 = vmatprep.mubr.msk.f32.mxu1 %vm222_vm14, %v6334_v50 }
 0x52f   :  { %5801 = vmatprep.subr.bf16.mxu1 %v5800_v45 }
 0x532   :  { %v5336_v46 = vpop.f32.mrb[8].mxu0  ;;  %5803 = vmatpush3.bf16.msra.mxu1 %v5800_v45 }
 0x533   :  { %v799_v47 = vpop.f32.mrb[9].mxu0 }
 0x535   :  { %5346 = vmatmul.mubr.msk.f32.vlgmr.msra.gmra.mrb[6].mxu1 %vm222_vm14, %v6336_v51 }
 0x536   :  { %5363 = vmatprep.mubr.msk.f32.mxu1 %vm454_vm15, %v799_v47 }
 0x53a   :  { %v5358_v48 = vpop.f32.mrb[10].mxu0 }
 0x53b   :  { %v949_v49 = vpop.f32.mrb[11].mxu0 }
 0x53c   :  { %v5818_v52 = vpack.c.bf16 %v5358_v48, %v949_v49 }
 0x53e   :  { %5819 = vmatprep.subr.bf16.mxu0 %v5818_v52 }
 0x53f   :  { %5821 = vmatpush3.bf16.msra.mxu0 %v5818_v52 }
 0x540   :  { %5823 = vmatprep.subr.bf16.mxu0 %v5822_v15 }
 0x608   :  { %v5347_v53 = vpop.f32.mrb[6].mxu1 }
 0x609   :  { %v874_v54 = vpop.f32.mrb[7].mxu1 }
 0x60a   :  { %v5812_v55 = vpack.c.bf16 %v5347_v53, %v874_v54 }
 0x60c   :  { %5814 = vmatprep.subr.msk.bf16.mxu1 %vm6352_vm0, %v5812_v55 }
 0x60d   :  { %5817 = vmatpush3.bf16.xpose.msk.msra.mxu1 %vm6352_vm0, %v5812_v55 }
 0x60e   :  { %5373 = vmatprep.subr.mxu1 %v219_v16 }
 0x614   :  { %5364 = vmatmul.mubr.msk.f32.vlgmr.msra.gmra.mrb[8].mxu1 %vm454_vm15, %v5336_v46 }
 0x615   :  { %5374 = vmatpush3.msra.mxu1 %v219_v16  ;;  %v185_v16 = vld [vmem:[%s6973_s4 + $0x78] sm:$0xff] }
 0x616   :  { %5831 = vmatprep.subr.bf16.mxu1 %v5830_v34 }
 0x6e7   :  { %v5365_v56 = vpop.f32.mrb[8].mxu1 }
 0x6e8   :  { %v1036_v58 = vpop.f32.mrb[9].mxu1  ;;  %v1046_v59 = vmul.f32 0.35355338, %v5365_v56 }
 0x6e9   :  { %v1045_v60 = vmul.f32 0.35355338, %v1036_v58 }
 0x6ea   :  { %v1048_v63 = vadd.f32 %v1046_v59, %v6368_v4 }
 0x6eb   :  { %v1047_v61 = vadd.f32 %v1045_v60, %v6364_v0 }
 0x6ec   :  { %v1052_v1 = vsel %vm546_vm2, %v1048_v63, -inf }
 0x6ed   :  { %v1049_v62 = vsel %vm546_vm2, %v1047_v61, -inf }
 0x6ee   :  { %1050 = vmax.xlane.f32.xlu1 %v1049_v62 }
 0x6f2   :  { %1053 = vmax.xlane.f32.xlu1 %v1052_v1 }
 0x77b   :  { %v1051_v2 = vpop.xlane.xlu1 %1050 }
 0x77c   :  { %v1055_v3 = vsub.f32 %v1047_v61, %v1051_v2 }
 0x77e   :  { %v1057_v5 = vmul.f32 1.442695, %v1055_v3 }
 0x77f   :  { %v1054_v6 = vpop.xlane.xlu1 %1053 }
 0x780   :  { %6103 = vpow2.f32 %v1057_v5  ;;  %v1056_v7 = vsub.f32 %v1048_v63, %v1054_v6 }
 0x782   :  { %v1059_v8 = vmul.f32 1.442695, %v1056_v7  ;;  %v182_v7 = vld [vmem:[%s6973_s4 + $0x60] sm:$0xff] }
 0x784   :  { %6105 = vpow2.f32 %v1059_v8  ;;  %v183_v8 = vld [vmem:[%s6973_s4 + $0x68] sm:$0xff] }
 0x78a   :  { %v6104_v9 = vpop.eup %6103 }
 0x78b   :  { %v1061_v10 = vsel %vm546_vm2, %v6104_v9, 0.0 }
 0x78c   :  { %1062 = vadd.xlane.f32.xlu1 %v1061_v10  ;;  %v220_v10 = vld [vmem:[%s6976_s7 + $0x10] sm:$0xff] }
 0x78e   :  { %v6106_v11 = vpop.eup %6105 }
 0x78f   :  { %v1064_v12 = vsel %vm546_vm2, %v6106_v11, 0.0 }
 0x790   :  { %1065 = vadd.xlane.f32.xlu1 %v1064_v12 }
 0x819   :  { %v1063_v17 = vpop.xlane.xlu1 %1062 }
 0x81a   :  { %6107 = vrcp.f32 %v1063_v17 }
 0x81d   :  { %v1066_v18 = vpop.xlane.xlu1 %1065 }
 0x81e   :  { %6109 = vrcp.f32 %v1066_v18 }
 0x824   :  { %v6108_v19 = vpop.eup %6107 }
 0x825   :  { %v1069_v20 = vmul.f32 %v6108_v19, %v6104_v9  ;;  %v5856_v9 = vpack.c.bf16 %v183_v8, %v182_v7 }
 0x827   :  { %5370 = vmatprep.mubr.msk.f32.mxu0 %vm546_vm2, %v1069_v20  ;;  %v214_v20 = vld [vmem:[%s6975_s6 + $0x60] sm:$0xff] }
 0x828   :  { %v6110_v23 = vpop.eup %6109  ;;  %v5872_v22 = vpack.c.bf16 %v215_v21, %v214_v20  ;;  %v2271_v20 = vld [vmem:[%s6977_s8 + $0x10] sm:$0xff] }
 0x829   :  { %v1070_v24 = vmul.f32 %v6110_v23, %v6106_v11  ;;  %v216_v23 = vld [vmem:[%s6975_s6 + $0x70] sm:$0xff] }
 0x82b   :  { %5371 = vmatmul.mubr.msk.f32.vlgmr.msra.gmra.mrb[12].mxu0 %vm546_vm2, %v1070_v24  ;;  %v217_v24 = vld [vmem:[%s6975_s6 + $0x78] sm:$0xff] }
 0x82c   :  { %5825 = vmatpush3.bf16.msra.mxu0 %v5822_v15  ;;  %5386 = vmatprep.mubr.msk.f32.mxu0 %vm222_vm14, %v6334_v50  ;;  %v184_v15 = vld [vmem:[%s6973_s4 + $0x70] sm:$0xff] }
 0x82d   :  { %5827 = vmatprep.subr.bf16.mxu0 %v5826_v25  ;;  %v5860_v19 = vpack.c.bf16 %v185_v16, %v184_v15 }
 0x830   :  { %5829 = vmatpush3.bf16.msra.mxu0 %v5826_v25  ;;  %v5876_v25 = vpack.c.bf16 %v217_v24, %v216_v23  ;;  %v2356_v24 = vld [vmem:[%s6978_s9] sm:$0xff] }
 0x831   :  { %5839 = vmatprep.subr.bf16.mxu0 %v5838_v28 }
 0x833   :  { %5387 = vmatmul.mubr.msk.f32.vlgmr.msra.gmra.mrb[14].mxu0 %vm222_vm14, %v6336_v51 }
 0x834   :  { %5841 = vmatpush3.bf16.msra.mxu0 %v5838_v28  ;;  %5408 = vmatprep.mubr.msk.f32.mxu0 %vm222_vm14, %v6334_v50  ;;  %v5864_v28 = vpack.c.bf16 %v199_v27, %v198_v26  ;;  %v2358_v26 = vld [vmem:[%s6978_s9 + $0x10] sm:$0xff] }
 0x835   :  { %5843 = vmatprep.subr.bf16.mxu0 %v5842_v31 }
 0x838   :  { %5845 = vmatpush3.bf16.msra.mxu0 %v5842_v31 }
 0x83b   :  { %5409 = vmatmul.mubr.msk.f32.vlgmr.msra.gmra.mrb[16].mxu0 %vm222_vm14, %v6336_v51 }
 0x8fe   :  { %v5372_v37 = vpop.f32.mrb[12].mxu0 }
 0x8ff   :  { %v1143_v38 = vpop.f32.mrb[13].mxu0 }
 0x900   :  { %5375 = vmatprep.mubr.msk.f32.mxu1 %vm454_vm15, %v1143_v38 }
 0x901   :  { %5376 = vmatmul.mubr.msk.f32.vlgmr.msra.gmra.mrb[4].mxu1 %vm454_vm15, %v5372_v37 }
 0x902   :  { %5833 = vmatpush3.bf16.msra.mxu1 %v5830_v34  ;;  %5397 = vmatprep.mubr.msk.f32.mxu1 %vm222_vm14, %v6334_v50 }
 0x903   :  { %5835 = vmatprep.subr.bf16.mxu1 %v5834_v39 }
 0x906   :  { %v5388_v40 = vpop.f32.mrb[14].mxu0  ;;  %5837 = vmatpush3.bf16.msra.mxu1 %v5834_v39 }
 0x907   :  { %v1301_v41 = vpop.f32.mrb[15].mxu0 }
 0x909   :  { %5398 = vmatmul.mubr.msk.f32.vlgmr.msra.gmra.mrb[10].mxu1 %vm222_vm14, %v6336_v51 }
 0x90a   :  { %5415 = vmatprep.mubr.msk.f32.mxu1 %vm454_vm15, %v1301_v41 }
 0x90e   :  { %v5410_v42 = vpop.f32.mrb[16].mxu0 }
 0x90f   :  { %v1451_v43 = vpop.f32.mrb[17].mxu0 }
 0x910   :  { %v5852_v44 = vpack.c.bf16 %v5410_v42, %v1451_v43 }
 0x912   :  { %5853 = vmatprep.subr.bf16.mxu0 %v5852_v44 }
 0x913   :  { %5855 = vmatpush3.bf16.msra.mxu0 %v5852_v44 }
 0x914   :  { %5857 = vmatprep.subr.bf16.mxu0 %v5856_v9 }
 0x9dc   :  { %v5399_v45 = vpop.f32.mrb[10].mxu1 }
 0x9dd   :  { %v1376_v46 = vpop.f32.mrb[11].mxu1 }
 0x9de   :  { %v5846_v47 = vpack.c.bf16 %v5399_v45, %v1376_v46 }
 0x9e0   :  { %5848 = vmatprep.subr.msk.bf16.mxu1 %vm6352_vm0, %v5846_v47 }
 0x9e1   :  { %5851 = vmatpush3.bf16.xpose.msk.msra.mxu1 %vm6352_vm0, %v5846_v47 }
 0x9e2   :  { %5425 = vmatprep.subr.mxu1 %v220_v10 }
 0x9e8   :  { %5416 = vmatmul.mubr.msk.f32.vlgmr.msra.gmra.mrb[12].mxu1 %vm454_vm15, %v5388_v40 }
 0x9e9   :  { %5426 = vmatpush3.msra.mxu1 %v220_v10 }
 0x9ea   :  { %5865 = vmatprep.subr.bf16.mxu1 %v5864_v28 }
 0xabb   :  { %v5417_v48 = vpop.f32.mrb[12].mxu1 }
 0xabc   :  { %v1538_v49 = vpop.f32.mrb[13].mxu1  ;;  %v1548_v52 = vmul.f32 0.35355338, %v5417_v48 }
 0xabd   :  { %v1547_v53 = vmul.f32 0.35355338, %v1538_v49 }
 0xabe   :  { %v1550_v56 = vadd.f32 %v1548_v52, %v6368_v4 }
 0xabf   :  { %v1549_v54 = vadd.f32 %v1547_v53, %v6364_v0 }
 0xac0   :  { %v1554_v58 = vsel %vm546_vm2, %v1550_v56, -inf }
 0xac1   :  { %v1551_v55 = vsel %vm546_vm2, %v1549_v54, -inf }
 0xac2   :  { %1552 = vmax.xlane.f32.xlu1 %v1551_v55 }
 0xac6   :  { %1555 = vmax.xlane.f32.xlu1 %v1554_v58 }
 0xb4f   :  { %v1553_v59 = vpop.xlane.xlu1 %1552 }
 0xb50   :  { %v1557_v60 = vsub.f32 %v1549_v54, %v1553_v59 }
 0xb52   :  { %v1559_v61 = vmul.f32 1.442695, %v1557_v60 }
 0xb53   :  { %v1556_v62 = vpop.xlane.xlu1 %1555 }
 0xb54   :  { %6111 = vpow2.f32 %v1559_v61  ;;  %v1558_v63 = vsub.f32 %v1550_v56, %v1556_v62 }
 0xb56   :  { %v1561_v1 = vmul.f32 1.442695, %v1558_v63  ;;  %v221_v63 = vld [vmem:[%s6976_s7 + $0x18] sm:$0xff] }
 0xb58   :  { %6113 = vpow2.f32 %v1561_v1 }
 0xb5e   :  { %v6112_v2 = vpop.eup %6111 }
 0xb5f   :  { %v1563_v3 = vsel %vm546_vm2, %v6112_v2, 0.0 }
 0xb60   :  { %1564 = vadd.xlane.f32.xlu1 %v1563_v3 }
 0xb62   :  { %v6114_v5 = vpop.eup %6113 }
 0xb63   :  { %v1566_v6 = vsel %vm546_vm2, %v6114_v5, 0.0 }
 0xb64   :  { %1567 = vadd.xlane.f32.xlu0 %v1566_v6 }
 0xbed   :  { %v1565_v11 = vpop.xlane.xlu1 %1564 }
 0xbee   :  { %6115 = vrcp.f32 %v1565_v11 }
 0xbf1   :  { %v1568_v12 = vpop.xlane.xlu0 %1567 }
 0xbf2   :  { %6117 = vrcp.f32 %v1568_v12 }
 0xbf8   :  { %v6116_v13 = vpop.eup %6115 }
 0xbf9   :  { %v1571_v14 = vmul.f32 %v6116_v13, %v6112_v2 }
 0xbfb   :  { %5422 = vmatprep.mubr.msk.f32.mxu0 %vm546_vm2, %v1571_v14 }
 0xbfc   :  { %v6118_v17 = vpop.eup %6117 }
 0xbfd   :  { %v1572_v18 = vmul.f32 %v6118_v17, %v6114_v5 }
 0xbff   :  { %5423 = vmatmul.mubr.msk.f32.vlgmr.msra.gmra.mrb[18].mxu0 %vm546_vm2, %v1572_v18 }
 0xc00   :  { %5859 = vmatpush3.bf16.msra.mxu0 %v5856_v9  ;;  %5438 = vmatprep.mubr.msk.f32.mxu0 %vm222_vm14, %v6334_v50 }
 0xc01   :  { %5861 = vmatprep.subr.bf16.mxu0 %v5860_v19 }
 0xc04   :  { %5863 = vmatpush3.bf16.msra.mxu0 %v5860_v19 }
 0xc05   :  { %5873 = vmatprep.subr.bf16.mxu0 %v5872_v22 }
 0xc07   :  { %5439 = vmatmul.mubr.msk.f32.vlgmr.msra.gmra.mrb[20].mxu0 %vm222_vm14, %v6336_v51 }
 0xc08   :  { %5875 = vmatpush3.bf16.msra.mxu0 %v5872_v22  ;;  %5460 = vmatprep.mubr.msk.f32.mxu0 %vm222_vm14, %v6334_v50  ;;  %v2272_v22 = vld [vmem:[%s6977_s8 + $0x18] sm:$0xff] }
 0xc09   :  { %5877 = vmatprep.subr.bf16.mxu0 %v5876_v25  ;;  %v5894_v23 = vpack.c.bf16 %v2272_v22, %v2271_v20  ;;  %v4889_v22 = vld [vmem:[%s6974_s5 + $0x88] sm:$0xff] }
 0xc0c   :  { %5879 = vmatpush3.bf16.msra.mxu0 %v5876_v25  ;;  %v2357_v25 = vld [vmem:[%s6978_s9 + $0x8] sm:$0xff] }
 0xc0d   :  { %v5898_v27 = vpack.c.bf16 %v2357_v25, %v2356_v24 }
 0xc0f   :  { %5461 = vmatmul.mubr.msk.f32.vlgmr.msra.gmra.mrb[22].mxu0 %vm222_vm14, %v6336_v51 }
 0xcd2   :  { %v5424_v31 = vpop.f32.mrb[18].mxu0 }
 0xcd3   :  { %v1645_v32 = vpop.f32.mrb[19].mxu0 }
 0xcd4   :  { %5427 = vmatprep.mubr.msk.f32.mxu1 %vm454_vm15, %v1645_v32 }
 0xcd5   :  { %5428 = vmatmul.mubr.msk.f32.vlgmr.msra.gmra.mrb[4].mxu1 %vm454_vm15, %v5424_v31  ;;  %v2361_v31 = vld [vmem:[%s6978_s9 + $0x28] sm:$0xff] }
 0xcd6   :  { %5867 = vmatpush3.bf16.msra.mxu1 %v5864_v28  ;;  %5449 = vmatprep.mubr.msk.f32.mxu1 %vm222_vm14, %v6334_v50  ;;  %v2359_v28 = vld [vmem:[%s6978_s9 + $0x18] sm:$0xff]  ;;  %v5906_v32 = vpack.c.bf16 %v2361_v31, %v2360_v30 }
 0xcd7   :  { %5869 = vmatprep.subr.bf16.mxu1 %v5868_v33  ;;  %v5902_v29 = vpack.c.bf16 %v2359_v28, %v2358_v26 }
 0xcda   :  { %v5440_v34 = vpop.f32.mrb[20].mxu0  ;;  %5871 = vmatpush3.bf16.msra.mxu1 %v5868_v33 }
 0xcdb   :  { %v1803_v35 = vpop.f32.mrb[21].mxu0 }
 0xcdd   :  { %5450 = vmatmul.mubr.msk.f32.vlgmr.msra.gmra.mrb[14].mxu1 %vm222_vm14, %v6336_v51 }
 0xcde   :  { %5467 = vmatprep.mubr.msk.f32.mxu1 %vm454_vm15, %v1803_v35 }
 0xce2   :  { %v5462_v36 = vpop.f32.mrb[22].mxu0 }
 0xce3   :  { %v1953_v37 = vpop.f32.mrb[23].mxu0 }
 0xce4   :  { %v5886_v38 = vpack.c.bf16 %v5462_v36, %v1953_v37 }
 0xce6   :  { %5887 = vmatprep.subr.bf16.mxu0 %v5886_v38 }
 0xce7   :  { %5889 = vmatpush3.bf16.msra.mxu0 %v5886_v38 }
 0xdb0   :  { %v5451_v39 = vpop.f32.mrb[14].mxu1 }
 0xdb1   :  { %v1878_v40 = vpop.f32.mrb[15].mxu1 }
 0xdb2   :  { %v5880_v41 = vpack.c.bf16 %v5451_v39, %v1878_v40 }
 0xdb4   :  { %5882 = vmatprep.subr.msk.bf16.mxu1 %vm6352_vm0, %v5880_v41 }
 0xdb5   :  { %5885 = vmatpush3.bf16.xpose.msk.msra.mxu1 %vm6352_vm0, %v5880_v41 }
 0xdb6   :  { %5477 = vmatprep.subr.mxu1 %v221_v63 }
 0xdbc   :  { %5468 = vmatmul.mubr.msk.f32.vlgmr.msra.gmra.mrb[16].mxu1 %vm454_vm15, %v5440_v34 }
 0xdbd   :  { %5478 = vmatpush3.msra.mxu1 %v221_v63 }
 0xdbe   :  { %5899 = vmatprep.subr.bf16.mxu1 %v5898_v27 }
 0xe8f   :  { %v5469_v42 = vpop.f32.mrb[16].mxu1 }
 0xe90   :  { %v2050_v43 = vmul.f32 0.35355338, %v5469_v42  ;;  %v2040_v44 = vpop.f32.mrb[17].mxu1 }
 0xe91   :  { %v2049_v45 = vmul.f32 0.35355338, %v2040_v44 }
 0xe92   :  { %v2052_v46 = vadd.f32 %v2050_v43, %v6368_v4 }
 0xe93   :  { %v2051_v47 = vadd.f32 %v2049_v45, %v6364_v0 }
 0xe94   :  { %v2056_v48 = vsel %vm546_vm2, %v2052_v46, -inf }
 0xe95   :  { %2057 = vmax.xlane.f32.xlu0 %v2056_v48  ;;  %v2053_v49 = vsel %vm546_vm2, %v2051_v47, -inf }
 0xe96   :  { %2054 = vmax.xlane.f32.xlu1 %v2053_v49 }
 0xf22   :  { %v2058_v52 = vpop.xlane.xlu0 %2057 }
 0xf23   :  { %v2060_v53 = vsub.f32 %v2052_v46, %v2058_v52  ;;  %v2055_v54 = vpop.xlane.xlu1 %2054 }
 0xf24   :  { %v2059_v55 = vsub.f32 %v2051_v47, %v2055_v54 }
 0xf25   :  { %v2063_v56 = vmul.f32 1.442695, %v2060_v53 }
 0xf26   :  { %v2061_v58 = vmul.f32 1.442695, %v2059_v55  ;;  %v2362_v55 = vld [vmem:[%s6978_s9 + $0x30] sm:$0xff] }
 0xf27   :  { %6119 = vpow2.f32 %v2063_v56  ;;  %v2363_v56 = vld [vmem:[%s6978_s9 + $0x38] sm:$0xff] }
 0xf28   :  { %6121 = vpow2.f32 %v2061_v58  ;;  %v5910_v58 = vpack.c.bf16 %v2363_v56, %v2362_v55  ;;  %v4877_v55 = vld [vmem:[%s6973_s4 + $0xa8] sm:$0xff] }
 0xf31   :  { %v6120_v59 = vpop.eup %6119 }
 0xf32   :  { %v6122_v60 = vpop.eup %6121  ;;  %v2068_v61 = vsel %vm546_vm2, %v6120_v59, 0.0 }
 0xf33   :  { %2069 = vadd.xlane.f32.xlu0 %v2068_v61  ;;  %v2065_v62 = vsel %vm546_vm2, %v6122_v60, 0.0 }
 0xf34   :  { %2066 = vadd.xlane.f32.xlu1 %v2065_v62 }
 0xfc0   :  { %v2070_v1 = vpop.xlane.xlu0 %2069 }
 0xfc1   :  { %6123 = vrcp.f32 %v2070_v1  ;;  %v2067_v2 = vpop.xlane.xlu1 %2066 }
 0xfc2   :  { %6125 = vrcp.f32 %v2067_v2 }
 0xfcb   :  { %v6124_v3 = vpop.eup %6123 }
 0xfcc   :  { %v6126_v5 = vpop.eup %6125  ;;  %v2074_v7 = vmul.f32 %v6124_v3, %v6120_v59 }
 0xfcd   :  { %v2073_v6 = vmul.f32 %v6126_v5, %v6122_v60 }
 0xfcf   :  { %5474 = vmatprep.mubr.msk.f32.mxu0 %vm546_vm2, %v2073_v6 }
 0xfd0   :  { %5475 = vmatmul.mubr.msk.f32.vlgmr.msra.gmra.mrb[24].mxu0 %vm546_vm2, %v2074_v7 }
0x10a3   :  { %v5476_v8 = vpop.f32.mrb[24].mxu0 }
0x10a4   :  { %v2147_v9 = vpop.f32.mrb[25].mxu0 }
0x10a5   :  { %5479 = vmatprep.mubr.msk.f32.mxu1 %vm454_vm15, %v2147_v9 }
0x10a6   :  { %5480 = vmatmul.mubr.msk.f32.vlgmr.msra.gmra.mrb[4].mxu1 %vm454_vm15, %v5476_v8 }
0x10a7   :  { %5901 = vmatpush3.bf16.msra.mxu1 %v5898_v27 }
0x10a8   :  { %5903 = vmatprep.subr.bf16.mxu1 %v5902_v29 }
0x10ab   :  { %5905 = vmatpush3.bf16.msra.mxu1 %v5902_v29 }
0x10ac   :  { %5907 = vmatprep.subr.bf16.mxu1 %v5906_v32 }
0x10af   :  { %5909 = vmatpush3.bf16.msra.mxu1 %v5906_v32 }
0x10b0   :  { %5911 = vmatprep.subr.bf16.mxu1 %v5910_v58 }
0x10b3   :  { %5913 = vmatpush3.bf16.msra.mxu1 %v5910_v58 }
0x1179   :  { %v5481_v10 = vpop.f32.mrb[4].mxu1 }
0x117a   :  { %v6074_v11 = vadd.f32 %v5481_v10, %v6336_v51  ;;  %v2228_v12 = vpop.f32.mrb[5].mxu1  ;;  %v2269_v51 = vld [vmem:[%s6977_s8] sm:$0xff] }
0x117b   :  { %v6075_v13 = vadd.f32 %v2228_v12, %v6334_v50  ;;  %v2270_v50 = vld [vmem:[%s6977_s8 + $0x8] sm:$0xff] }
0x117c   :  { %v2242_v14 = vsel %vm222_vm14, %v6074_v11, 0.0  ;;  %v2248_v15 = vmul.f32 %v6074_v11, %v6074_v11  ;;  %v5890_v21 = vpack.c.bf16 %v2270_v50, %v2269_v51  ;;  %v4873_v12 = vld [vmem:[%s6973_s4 + $0x88] sm:$0xff]  ;;  %v4906_v51 = vld [vmem:[%s6975_s6 + $0x90] sm:$0xff]  ;;  %v4907_v50 = vld [vmem:[%s6975_s6 + $0x98] sm:$0xff] }
0x117d   :  { %2243 = vadd.xlane.f32.xlu0 %v2242_v14  ;;  %v2239_v16 = vsel %vm222_vm14, %v6075_v13, 0.0  ;;  %v2247_v17 = vmul.f32 %v6075_v13, %v6075_v13  ;;  %v4904_v14 = vld [vmem:[%s6975_s6 + $0x80] sm:$0xff]  ;;  %v5934_v20 = vpack.c.bf16 %v4907_v50, %v4906_v51 }
0x117e   :  { %2240 = vadd.xlane.f32.xlu1 %v2239_v16  ;;  %v2252_v18 = vsel %vm222_vm14, %v2248_v15, 0.0  ;;  %5891 = vmatprep.subr.bf16.mxu0 %v5890_v21  ;;  %v4905_v15 = vld [vmem:[%s6975_s6 + $0x88] sm:$0xff] }
0x117f   :  { %v2249_v19 = vsel %vm222_vm14, %v2247_v17, 0.0  ;;  %5893 = vmatpush3.bf16.msra.mxu0 %v5890_v21  ;;  %v5930_v16 = vpack.c.bf16 %v4905_v15, %v4904_v14  ;;  %v4874_v17 = vld [vmem:[%s6973_s4 + $0x90] sm:$0xff]  ;;  %v4888_v21 = vld [vmem:[%s6974_s5 + $0x80] sm:$0xff] }
0x1180   :  { %5895 = vmatprep.subr.bf16.mxu0 %v5894_v23 }
0x1181   :  { %2253 = vadd.xlane.f32.xlu0 %v2252_v18  ;;  %5931 = vmatprep.subr.bf16.mxu1 %v5930_v16  ;;  %v4875_v18 = vld [vmem:[%s6973_s4 + $0x98] sm:$0xff] }
0x1182   :  { %2250 = vadd.xlane.f32.xlu1 %v2249_v19  ;;  %v5918_v19 = vpack.c.bf16 %v4875_v18, %v4874_v17 }
0x1183   :  { %5897 = vmatpush3.bf16.msra.mxu0 %v5894_v23  ;;  %v5922_v23 = vpack.c.bf16 %v4889_v22, %v4888_v21 }
0x120a   :  { %v2244_v33 = vpop.xlane.xlu0 %2243 }
0x120b   :  { %v2246_v34 = vmul.f32 0.03125, %v2244_v33  ;;  %v2241_v35 = vpop.xlane.xlu1 %2240 }
0x120c   :  { %v2245_v36 = vmul.f32 0.03125, %v2241_v35 }
0x120d   :  { %v2258_v38 = vmul.f32 %v2246_v34, %v2246_v34  ;;  %v2262_v52 = vsub.f32 %v6074_v11, %v2246_v34  ;;  %v4872_v11 = vld [vmem:[%s6973_s4 + $0x80] sm:$0xff] }
0x120e   :  { %v2254_v37 = vpop.xlane.xlu0 %2253  ;;  %v2257_v41 = vmul.f32 %v2245_v36, %v2245_v36  ;;  %v2261_v48 = vsub.f32 %v6075_v13, %v2245_v36  ;;  %v5914_v13 = vpack.c.bf16 %v4873_v12, %v4872_v11 }
0x120f   :  { %v2256_v39 = vmul.f32 0.03125, %v2254_v37  ;;  %v2251_v40 = vpop.xlane.xlu1 %2250 }
0x1210   :  { %v2255_v42 = vmul.f32 0.03125, %v2251_v40  ;;  %5915 = vmatprep.subr.bf16.mxu0 %v5914_v13  ;;  %v4890_v40 = vld [vmem:[%s6974_s5 + $0x90] sm:$0xff] }
0x1211   :  { %v2260_v43 = vsub.f32 %v2256_v39, %v2258_v38 }
0x1212   :  { %v2259_v44 = vsub.f32 %v2255_v42, %v2257_v41  ;;  %v4891_v41 = vld [vmem:[%s6974_s5 + $0x98] sm:$0xff] }
0x1213   :  { %v2264_v45 = vadd.f32 1e-05, %v2260_v43 }
0x1214   :  { %v2263_v46 = vadd.f32 1e-05, %v2259_v44 }
0x1215   :  { %6127 = vrsqrt.f32 %v2264_v45 }
0x1216   :  { %6129 = vrsqrt.f32 %v2263_v46  ;;  %v5926_v46 = vpack.c.bf16 %v4891_v41, %v4890_v40  ;;  %v4895_v40 = vld [vmem:[%s6974_s5 + $0xb8] sm:$0xff] }
0x121f   :  { %v6128_v47 = vpop.eup %6127 }
0x1220   :  { %v6130_v49 = vpop.eup %6129  ;;  %v2268_v54 = vmul.f32 %v6128_v47, %v2262_v52 }
0x1221   :  { %v2267_v53 = vmul.f32 %v6130_v49, %v2261_v48 }
0x1223   :  { %5490 = vmatprep.mubr.msk.f32.mxu0 %vm222_vm14, %v2267_v53 }
0x1224   :  { %5491 = vmatmul.mubr.msk.f32.vlgmr.msra.gmra.mrb[26].mxu0 %vm222_vm14, %v2268_v54 }
0x1225   :  { %5917 = vmatpush3.bf16.msra.mxu0 %v5914_v13 }
0x1226   :  { %5919 = vmatprep.subr.bf16.mxu0 %v5918_v19 }
0x1229   :  { %5921 = vmatpush3.bf16.msra.mxu0 %v5918_v19 }
0x122a   :  { %5923 = vmatprep.subr.bf16.mxu0 %v5922_v23 }
0x12f7   :  { %v5492_v59 = vpop.f32.mrb[26].mxu0 }
0x12f8   :  { %v2345_v60 = vpop.f32.mrb[27].mxu0  ;;  %v2355_v62 = vmax.f32 %v5492_v59, 0.0 }
0x12f9   :  { %v2354_v61 = vmax.f32 %v2345_v60, 0.0 }
0x12fb   :  { %5509 = vmatprep.mubr.msk.f32.mxu1 %vm2364_vm3, %v2354_v61  ;;  %v4878_v61 = vld [vmem:[%s6973_s4 + $0xb0] sm:$0xff] }
0x12fc   :  { %5510 = vmatmul.mubr.msk.f32.vlgmr.msra.gmra.mrb[18].mxu1 %vm2364_vm3, %v2355_v62  ;;  %v4879_v62 = vld [vmem:[%s6973_s4 + $0xb8] sm:$0xff] }
0x12fd   :  { %5933 = vmatpush3.bf16.msra.mxu1 %v5930_v16 }
0x12fe   :  { %5935 = vmatprep.subr.bf16.mxu1 %v5934_v20 }
0x1301   :  { %5937 = vmatpush3.bf16.msra.mxu1 %v5934_v20 }
0x13cf   :  { %v5511_v63 = vpop.f32.mrb[18].mxu1 }
0x13d0   :  { %v2443_v1 = vadd.f32 %v5511_v63, %v2268_v54  ;;  %v2437_v2 = vpop.f32.mrb[19].mxu1  ;;  %v4876_v54 = vld [vmem:[%s6973_s4 + $0xa0] sm:$0xff]  ;;  %v5952_v63 = vpack.c.bf16 %v4879_v62, %v4878_v61 }
0x13d1   :  { %v2438_v3 = vadd.f32 %v2437_v2, %v2267_v53  ;;  %v5948_v60 = vpack.c.bf16 %v4877_v55, %v4876_v54  ;;  %v4909_v2 = vld [vmem:[%s6975_s6 + $0xa8] sm:$0xff] }
0x13d2   :  { %v2449_v5 = vsel %vm222_vm14, %v2443_v1, 0.0  ;;  %v2455_v6 = vmul.f32 %v2443_v1, %v2443_v1 }
0x13d3   :  { %2450 = vadd.xlane.f32.xlu0 %v2449_v5  ;;  %v2446_v7 = vsel %vm222_vm14, %v2438_v3, 0.0  ;;  %v2454_v8 = vmul.f32 %v2438_v3, %v2438_v3  ;;  %v4910_v5 = vld [vmem:[%s6975_s6 + $0xb0] sm:$0xff] }
0x13d4   :  { %2447 = vadd.xlane.f32.xlu1 %v2446_v7  ;;  %v2459_v9 = vsel %vm222_vm14, %v2455_v6, 0.0  ;;  %v4911_v6 = vld [vmem:[%s6975_s6 + $0xb8] sm:$0xff] }
0x13d5   :  { %v2456_v10 = vsel %vm222_vm14, %v2454_v8, 0.0  ;;  %v5968_v7 = vpack.c.bf16 %v4911_v6, %v4910_v5 }
0x13d7   :  { %2460 = vadd.xlane.f32.xlu0 %v2459_v9 }
0x13d8   :  { %2457 = vadd.xlane.f32.xlu1 %v2456_v10 }
0x1460   :  { %v2451_v24 = vpop.xlane.xlu0 %2450 }
0x1461   :  { %v2453_v25 = vmul.f32 0.03125, %v2451_v24  ;;  %v2448_v26 = vpop.xlane.xlu1 %2447 }
0x1462   :  { %v2452_v27 = vmul.f32 0.03125, %v2448_v26 }
0x1463   :  { %v2465_v29 = vmul.f32 %v2453_v25, %v2453_v25  ;;  %v2469_v43 = vsub.f32 %v2443_v1, %v2453_v25  ;;  %v4908_v1 = vld [vmem:[%s6975_s6 + $0xa0] sm:$0xff] }
0x1464   :  { %v2461_v28 = vpop.xlane.xlu0 %2460  ;;  %v2464_v32 = vmul.f32 %v2452_v27, %v2452_v27  ;;  %v2468_v39 = vsub.f32 %v2438_v3, %v2452_v27  ;;  %v5964_v3 = vpack.c.bf16 %v4909_v2, %v4908_v1 }
0x1465   :  { %v2463_v30 = vmul.f32 0.03125, %v2461_v28  ;;  %v2458_v31 = vpop.xlane.xlu1 %2457 }
0x1466   :  { %v2462_v33 = vmul.f32 0.03125, %v2458_v31 }
0x1467   :  { %v2467_v34 = vsub.f32 %v2463_v30, %v2465_v29  ;;  %v4920_v29 = vld [vmem:[%s6976_s7 + $0x20] sm:$0xff] }
0x1468   :  { %v2466_v35 = vsub.f32 %v2462_v33, %v2464_v32 }
0x1469   :  { %v2471_v36 = vadd.f32 1e-05, %v2467_v34 }
0x146a   :  { %v2470_v37 = vadd.f32 1e-05, %v2466_v35 }
0x146b   :  { %6131 = vrsqrt.f32 %v2471_v36  ;;  %v4892_v36 = vld [vmem:[%s6974_s5 + $0xa0] sm:$0xff] }
0x146c   :  { %6133 = vrsqrt.f32 %v2470_v37  ;;  %v4893_v37 = vld [vmem:[%s6974_s5 + $0xa8] sm:$0xff] }
0x1475   :  { %v6132_v38 = vpop.eup %6131 }
0x1476   :  { %v6134_v42 = vpop.eup %6133  ;;  %v6672_v45 = vmul.f32 %v6132_v38, %v2469_v43  ;;  %v5956_v38 = vpack.c.bf16 %v4893_v37, %v4892_v36 }
0x1477   :  { %v6670_v44 = vmul.f32 %v6134_v42, %v2468_v39  ;;  %v4894_v39 = vld [vmem:[%s6974_s5 + $0xb0] sm:$0xff] }
0x1478   :  { %v5960_v43 = vpack.c.bf16 %v4895_v40, %v4894_v39 }
0x1479   :  { %5520 = vmatprep.mubr.msk.f32.mxu0 %vm222_vm14, %v6670_v44  ;;  %5542 = vmatprep.mubr.msk.f32.mxu1 %vm222_vm14, %v6670_v44 }
0x147a   :  { %5521 = vmatmul.mubr.msk.f32.vlgmr.msra.gmra.mrb[28].mxu0 %vm222_vm14, %v6672_v45  ;;  %5543 = vmatmul.mubr.msk.f32.vlgmr.msra.gmra.mrb[20].mxu1 %vm222_vm14, %v6672_v45 }
0x147b   :  { %5925 = vmatpush3.bf16.msra.mxu0 %v5922_v23  ;;  %5531 = vmatprep.mubr.msk.f32.mxu0 %vm222_vm14, %v6670_v44 }
0x147c   :  { %5927 = vmatprep.subr.bf16.mxu0 %v5926_v46 }
0x147f   :  { %5929 = vmatpush3.bf16.msra.mxu0 %v5926_v46 }
0x1482   :  { %5532 = vmatmul.mubr.msk.f32.vlgmr.msra.gmra.mrb[30].mxu0 %vm222_vm14, %v6672_v45 }
0x154d   :  { %v5522_v47 = vpop.f32.mrb[28].mxu0  ;;  %v5544_v48 = vpop.f32.mrb[20].mxu1 }
0x154e   :  { %v2604_v49 = vpop.f32.mrb[29].mxu0  ;;  %v2754_v52 = vpop.f32.mrb[21].mxu1 }
0x154f   :  { %v5944_v53 = vpack.c.bf16 %v5544_v48, %v2754_v52  ;;  %5549 = vmatprep.mubr.msk.f32.mxu0 %vm454_vm15, %v2604_v49 }
0x1551   :  { %5945 = vmatprep.subr.bf16.mxu1 %v5944_v53 }
0x1552   :  { %5947 = vmatpush3.bf16.msra.mxu1 %v5944_v53 }
0x1553   :  { %5559 = vmatprep.subr.mxu1 %v4920_v29 }
0x1555   :  { %v5533_v56 = vpop.f32.mrb[30].mxu0 }
0x1556   :  { %v2679_v58 = vpop.f32.mrb[31].mxu0 }
0x1557   :  { %v5938_v59 = vpack.c.bf16 %v5533_v56, %v2679_v58 }
0x1559   :  { %5940 = vmatprep.subr.msk.bf16.mxu0 %vm6352_vm0, %v5938_v59 }
0x155a   :  { %5943 = vmatpush3.bf16.xpose.msk.msra.mxu0 %vm6352_vm0, %v5938_v59 }
0x155b   :  { %5949 = vmatprep.subr.bf16.mxu0 %v5948_v60 }
0x1561   :  { %5550 = vmatmul.mubr.msk.f32.vlgmr.msra.gmra.mrb[32].mxu0 %vm454_vm15, %v5522_v47 }
0x1562   :  { %5951 = vmatpush3.bf16.msra.mxu0 %v5948_v60  ;;  %5572 = vmatprep.mubr.msk.f32.mxu0 %vm222_vm14, %v6670_v44 }
0x1563   :  { %5953 = vmatprep.subr.bf16.mxu0 %v5952_v63 }
0x1566   :  { %5955 = vmatpush3.bf16.msra.mxu0 %v5952_v63 }
0x1567   :  { %5965 = vmatprep.subr.bf16.mxu0 %v5964_v3 }
0x1569   :  { %5573 = vmatmul.mubr.msk.f32.vlgmr.msra.gmra.mrb[34].mxu0 %vm222_vm14, %v6672_v45 }
0x156a   :  { %5967 = vmatpush3.bf16.msra.mxu0 %v5964_v3  ;;  %5594 = vmatprep.mubr.msk.f32.mxu0 %vm222_vm14, %v6670_v44 }
0x156b   :  { %5969 = vmatprep.subr.bf16.mxu0 %v5968_v7 }
0x156e   :  { %5971 = vmatpush3.bf16.msra.mxu0 %v5968_v7 }
0x1571   :  { %5595 = vmatmul.mubr.msk.f32.vlgmr.msra.gmra.mrb[36].mxu0 %vm222_vm14, %v6672_v45 }
0x1634   :  { %v5551_v8 = vpop.f32.mrb[32].mxu0 }
0x1635   :  { %v2851_v9 = vmul.f32 0.35355338, %v5551_v8  ;;  %v2841_v10 = vpop.f32.mrb[33].mxu0  ;;  %v4880_v8 = vld [vmem:[%s6973_s4 + $0xc0] sm:$0xff] }
0x1636   :  { %v2850_v11 = vmul.f32 0.35355338, %v2841_v10 }
0x1637   :  { %v2853_v12 = vadd.f32 %v2851_v9, %v6368_v4  ;;  %v4881_v9 = vld [vmem:[%s6973_s4 + $0xc8] sm:$0xff] }
0x1638   :  { %v2852_v13 = vadd.f32 %v2850_v11, %v6364_v0  ;;  %v5982_v10 = vpack.c.bf16 %v4881_v9, %v4880_v8  ;;  %v4921_v11 = vld [vmem:[%s6976_s7 + $0x28] sm:$0xff]  ;;  %v4886_v9 = vld [vmem:[%s6973_s4 + $0xf0] sm:$0xff] }
0x1639   :  { %v2857_v14 = vsel %vm546_vm2, %v2853_v12, -inf }
0x163a   :  { %2858 = vmax.xlane.f32.xlu0 %v2857_v14  ;;  %v2854_v15 = vsel %vm546_vm2, %v2852_v13, -inf }
0x163b   :  { %2855 = vmax.xlane.f32.xlu1 %v2854_v15  ;;  %v4882_v15 = vld [vmem:[%s6973_s4 + $0xd0] sm:$0xff] }
0x163c   :  { %v5574_v16 = vpop.f32.mrb[34].mxu0 }
0x163d   :  { %v3106_v17 = vpop.f32.mrb[35].mxu0 }
0x1644   :  { %v5596_v18 = vpop.f32.mrb[36].mxu0 }
0x1645   :  { %v3256_v19 = vpop.f32.mrb[37].mxu0 }
0x1646   :  { %v5978_v51 = vpack.c.bf16 %v5596_v18, %v3256_v19 }
0x1648   :  { %5979 = vmatprep.subr.bf16.mxu0 %v5978_v51 }
0x1649   :  { %5981 = vmatpush3.bf16.msra.mxu0 %v5978_v51 }
0x164a   :  { %5983 = vmatprep.subr.bf16.mxu0 %v5982_v10 }
0x16c7   :  { %v2859_v50 = vpop.xlane.xlu0 %2858 }
0x16c8   :  { %v2861_v20 = vsub.f32 %v2853_v12, %v2859_v50  ;;  %v2856_v21 = vpop.xlane.xlu1 %2855  ;;  %v4912_v50 = vld [vmem:[%s6975_s6 + $0xc0] sm:$0xff] }
0x16c9   :  { %v2860_v22 = vsub.f32 %v2852_v13, %v2856_v21 }
0x16ca   :  { %v2864_v23 = vmul.f32 1.442695, %v2861_v20  ;;  %v4913_v20 = vld [vmem:[%s6975_s6 + $0xc8] sm:$0xff] }
0x16cb   :  { %v2862_v24 = vmul.f32 1.442695, %v2860_v22  ;;  %v5998_v21 = vpack.c.bf16 %v4913_v20, %v4912_v50  ;;  %v4914_v22 = vld [vmem:[%s6975_s6 + $0xd0] sm:$0xff]  ;;  %v4900_v50 = vld [vmem:[%s6974_s5 + $0xe0] sm:$0xff]  ;;  %v4901_v20 = vld [vmem:[%s6974_s5 + $0xe8] sm:$0xff] }
0x16cc   :  { %6135 = vpow2.f32 %v2864_v23  ;;  %v4915_v23 = vld [vmem:[%s6975_s6 + $0xd8] sm:$0xff] }
0x16cd   :  { %6137 = vpow2.f32 %v2862_v24  ;;  %v6002_v24 = vpack.c.bf16 %v4915_v23, %v4914_v22  ;;  %v4902_v22 = vld [vmem:[%s6974_s5 + $0xf0] sm:$0xff]  ;;  %v4903_v23 = vld [vmem:[%s6974_s5 + $0xf8] sm:$0xff] }
0x16d6   :  { %v6136_v25 = vpop.eup %6135 }
0x16d7   :  { %v6138_v26 = vpop.eup %6137  ;;  %v2869_v27 = vsel %vm546_vm2, %v6136_v25, 0.0 }
0x16d8   :  { %2870 = vadd.xlane.f32.xlu0 %v2869_v27  ;;  %v2866_v28 = vsel %vm546_vm2, %v6138_v26, 0.0 }
0x16d9   :  { %2867 = vadd.xlane.f32.xlu1 %v2866_v28  ;;  %v4898_v28 = vld [vmem:[%s6974_s5 + $0xd0] sm:$0xff] }
0x1765   :  { %v2871_v30 = vpop.xlane.xlu0 %2870 }
0x1766   :  { %6139 = vrcp.f32 %v2871_v30  ;;  %v2868_v31 = vpop.xlane.xlu1 %2867 }
0x1767   :  { %6141 = vrcp.f32 %v2868_v31 }
0x1770   :  { %v6140_v32 = vpop.eup %6139 }
0x1771   :  { %v6142_v33 = vpop.eup %6141  ;;  %v2875_v35 = vmul.f32 %v6140_v32, %v6136_v25  ;;  %v4896_v25 = vld [vmem:[%s6974_s5 + $0xc0] sm:$0xff] }
0x1772   :  { %v2874_v34 = vmul.f32 %v6142_v33, %v6138_v26  ;;  %v4897_v26 = vld [vmem:[%s6974_s5 + $0xc8] sm:$0xff] }
0x1773   :  { %v5990_v27 = vpack.c.bf16 %v4897_v26, %v4896_v25  ;;  %v6028_v26 = vpack.c.bf16 %v4903_v23, %v4902_v22 }
0x1774   :  { %5556 = vmatprep.mubr.msk.f32.mxu1 %vm546_vm2, %v2874_v34 }
0x1775   :  { %5557 = vmatmul.mubr.msk.f32.vlgmr.msra.gmra.mrb[22].mxu1 %vm546_vm2, %v2875_v35 }
0x1776   :  { %5560 = vmatpush3.msra.mxu1 %v4920_v29  ;;  %v4899_v29 = vld [vmem:[%s6974_s5 + $0xd8] sm:$0xff] }
0x1777   :  { %5957 = vmatprep.subr.bf16.mxu1 %v5956_v38  ;;  %v5994_v32 = vpack.c.bf16 %v4899_v29, %v4898_v28 }
0x1848   :  { %v5558_v41 = vpop.f32.mrb[22].mxu1 }
0x1849   :  { %v2948_v42 = vpop.f32.mrb[23].mxu1 }
0x184a   :  { %5561 = vmatprep.mubr.msk.f32.mxu1 %vm454_vm15, %v2948_v42 }
0x184b   :  { %5562 = vmatmul.mubr.msk.f32.vlgmr.msra.gmra.mrb[24].mxu1 %vm454_vm15, %v5558_v41 }
0x184c   :  { %5959 = vmatpush3.bf16.msra.mxu1 %v5956_v38  ;;  %5583 = vmatprep.mubr.msk.f32.mxu1 %vm222_vm14, %v6670_v44 }
0x184d   :  { %5961 = vmatprep.subr.bf16.mxu1 %v5960_v43 }
0x1850   :  { %5963 = vmatpush3.bf16.msra.mxu1 %v5960_v43 }
0x1853   :  { %5584 = vmatmul.mubr.msk.f32.vlgmr.msra.gmra.mrb[26].mxu1 %vm222_vm14, %v6672_v45 }
0x1854   :  { %5601 = vmatprep.mubr.msk.f32.mxu1 %vm454_vm15, %v3106_v17 }
0x1926   :  { %v5585_v46 = vpop.f32.mrb[26].mxu1 }
0x1927   :  { %v3181_v47 = vpop.f32.mrb[27].mxu1 }
0x1928   :  { %v5972_v48 = vpack.c.bf16 %v5585_v46, %v3181_v47 }
0x192a   :  { %5974 = vmatprep.subr.msk.bf16.mxu1 %vm6352_vm0, %v5972_v48 }
0x192b   :  { %5977 = vmatpush3.bf16.xpose.msk.msra.mxu1 %vm6352_vm0, %v5972_v48 }
0x192c   :  { %5611 = vmatprep.subr.mxu1 %v4921_v11 }
0x1932   :  { %5602 = vmatmul.mubr.msk.f32.vlgmr.msra.gmra.mrb[28].mxu1 %vm454_vm15, %v5574_v16  ;;  %v4883_v16 = vld [vmem:[%s6973_s4 + $0xd8] sm:$0xff] }
0x1933   :  { %5612 = vmatpush3.msra.mxu1 %v4921_v11  ;;  %v5986_v51 = vpack.c.bf16 %v4883_v16, %v4882_v15  ;;  %v4916_v15 = vld [vmem:[%s6975_s6 + $0xe0] sm:$0xff]  ;;  %v4917_v16 = vld [vmem:[%s6975_s6 + $0xe8] sm:$0xff] }
0x1934   :  { %5991 = vmatprep.subr.bf16.mxu1 %v5990_v27 }
0x1a05   :  { %v5603_v49 = vpop.f32.mrb[28].mxu1 }
0x1a06   :  { %v3353_v52 = vmul.f32 0.35355338, %v5603_v49  ;;  %v3343_v53 = vpop.f32.mrb[29].mxu1 }
0x1a07   :  { %v3352_v54 = vmul.f32 0.35355338, %v3343_v53 }
0x1a08   :  { %v3355_v55 = vadd.f32 %v3353_v52, %v6368_v4 }
0x1a09   :  { %v3354_v56 = vadd.f32 %v3352_v54, %v6364_v0 }
0x1a0a   :  { %v3359_v58 = vsel %vm546_vm2, %v3355_v55, -inf }
0x1a0b   :  { %3360 = vmax.xlane.f32.xlu0 %v3359_v58  ;;  %v3356_v59 = vsel %vm546_vm2, %v3354_v56, -inf }
0x1a0c   :  { %3357 = vmax.xlane.f32.xlu1 %v3356_v59 }
0x1a98   :  { %v3361_v60 = vpop.xlane.xlu0 %3360 }
0x1a99   :  { %v3363_v61 = vsub.f32 %v3355_v55, %v3361_v60  ;;  %v3358_v62 = vpop.xlane.xlu1 %3357 }
0x1a9a   :  { %v3362_v63 = vsub.f32 %v3354_v56, %v3358_v62 }
0x1a9b   :  { %v3366_v1 = vmul.f32 1.442695, %v3363_v61 }
0x1a9c   :  { %v3364_v2 = vmul.f32 1.442695, %v3362_v63 }
0x1a9d   :  { %6143 = vpow2.f32 %v3366_v1  ;;  %v4884_v1 = vld [vmem:[%s6973_s4 + $0xe0] sm:$0xff] }
0x1a9e   :  { %6145 = vpow2.f32 %v3364_v2  ;;  %v4885_v2 = vld [vmem:[%s6973_s4 + $0xe8] sm:$0xff] }
0x1aa7   :  { %v6144_v3 = vpop.eup %6143 }
0x1aa8   :  { %v6146_v5 = vpop.eup %6145  ;;  %v3371_v6 = vsel %vm546_vm2, %v6144_v3, 0.0 }
0x1aa9   :  { %3372 = vadd.xlane.f32.xlu0 %v3371_v6  ;;  %v3368_v7 = vsel %vm546_vm2, %v6146_v5, 0.0 }
0x1aaa   :  { %3369 = vadd.xlane.f32.xlu1 %v3368_v7 }
0x1b36   :  { %v3373_v12 = vpop.xlane.xlu0 %3372 }
0x1b37   :  { %6147 = vrcp.f32 %v3373_v12  ;;  %v3370_v13 = vpop.xlane.xlu1 %3369 }
0x1b38   :  { %6149 = vrcp.f32 %v3370_v13 }
0x1b41   :  { %v6148_v14 = vpop.eup %6147 }
0x1b42   :  { %v6150_v17 = vpop.eup %6149  ;;  %v3377_v19 = vmul.f32 %v6148_v14, %v6144_v3  ;;  %v6016_v3 = vpack.c.bf16 %v4885_v2, %v4884_v1 }
0x1b43   :  { %v3376_v18 = vmul.f32 %v6150_v17, %v6146_v5  ;;  %v4922_v5 = vld [vmem:[%s6976_s7 + $0x30] sm:$0xff]  ;;  %v6032_v17 = vpack.c.bf16 %v4917_v16, %v4916_v15  ;;  %v4986_v16 = vld [vmem:[%s6978_s9 + $0x40] sm:$0xff] }
0x1b45   :  { %5608 = vmatprep.mubr.msk.f32.mxu0 %vm546_vm2, %v3376_v18  ;;  %v4918_v18 = vld [vmem:[%s6975_s6 + $0xf0] sm:$0xff] }
0x1b46   :  { %5609 = vmatmul.mubr.msk.f32.vlgmr.msra.gmra.mrb[38].mxu0 %vm546_vm2, %v3377_v19  ;;  %v4919_v19 = vld [vmem:[%s6975_s6 + $0xf8] sm:$0xff] }
0x1b47   :  { %5985 = vmatpush3.bf16.msra.mxu0 %v5982_v10  ;;  %5624 = vmatprep.mubr.msk.f32.mxu0 %vm222_vm14, %v6670_v44  ;;  %v4887_v10 = vld [vmem:[%s6973_s4 + $0xf8] sm:$0xff] }
0x1b48   :  { %5987 = vmatprep.subr.bf16.mxu0 %v5986_v51  ;;  %v6020_v14 = vpack.c.bf16 %v4887_v10, %v4886_v9 }
0x1b4b   :  { %5989 = vmatpush3.bf16.msra.mxu0 %v5986_v51  ;;  %v6036_v51 = vpack.c.bf16 %v4919_v19, %v4918_v18  ;;  %v4988_v18 = vld [vmem:[%s6978_s9 + $0x50] sm:$0xff] }
0x1b4c   :  { %5999 = vmatprep.subr.bf16.mxu0 %v5998_v21 }
0x1b4e   :  { %5625 = vmatmul.mubr.msk.f32.vlgmr.msra.gmra.mrb[40].mxu0 %vm222_vm14, %v6672_v45 }
0x1b4f   :  { %6001 = vmatpush3.bf16.msra.mxu0 %v5998_v21  ;;  %5646 = vmatprep.mubr.msk.f32.mxu0 %vm222_vm14, %v6670_v44  ;;  %v6024_v21 = vpack.c.bf16 %v4901_v20, %v4900_v50  ;;  %v4990_v20 = vld [vmem:[%s6978_s9 + $0x60] sm:$0xff] }
0x1b50   :  { %6003 = vmatprep.subr.bf16.mxu0 %v6002_v24 }
0x1b53   :  { %6005 = vmatpush3.bf16.msra.mxu0 %v6002_v24 }
0x1b56   :  { %5647 = vmatmul.mubr.msk.f32.vlgmr.msra.gmra.mrb[42].mxu0 %vm222_vm14, %v6672_v45 }
0x1c19   :  { %v5610_v30 = vpop.f32.mrb[38].mxu0 }
0x1c1a   :  { %v3450_v31 = vpop.f32.mrb[39].mxu0 }
0x1c1b   :  { %5613 = vmatprep.mubr.msk.f32.mxu1 %vm454_vm15, %v3450_v31 }
0x1c1c   :  { %5614 = vmatmul.mubr.msk.f32.vlgmr.msra.gmra.mrb[24].mxu1 %vm454_vm15, %v5610_v30 }
0x1c1d   :  { %5993 = vmatpush3.bf16.msra.mxu1 %v5990_v27  ;;  %5635 = vmatprep.mubr.msk.f32.mxu1 %vm222_vm14, %v6670_v44 }
0x1c1e   :  { %5995 = vmatprep.subr.bf16.mxu1 %v5994_v32 }
0x1c21   :  { %v5626_v33 = vpop.f32.mrb[40].mxu0  ;;  %5997 = vmatpush3.bf16.msra.mxu1 %v5994_v32 }
0x1c22   :  { %v3608_v34 = vpop.f32.mrb[41].mxu0 }
0x1c24   :  { %5636 = vmatmul.mubr.msk.f32.vlgmr.msra.gmra.mrb[30].mxu1 %vm222_vm14, %v6672_v45 }
0x1c25   :  { %5653 = vmatprep.mubr.msk.f32.mxu1 %vm454_vm15, %v3608_v34 }
0x1c29   :  { %v5648_v35 = vpop.f32.mrb[42].mxu0 }
0x1c2a   :  { %v3758_v36 = vpop.f32.mrb[43].mxu0 }
0x1c2b   :  { %v6012_v37 = vpack.c.bf16 %v5648_v35, %v3758_v36 }
0x1c2d   :  { %6013 = vmatprep.subr.bf16.mxu0 %v6012_v37 }
0x1c2e   :  { %6015 = vmatpush3.bf16.msra.mxu0 %v6012_v37 }
0x1c2f   :  { %6017 = vmatprep.subr.bf16.mxu0 %v6016_v3 }
0x1cf7   :  { %v5637_v38 = vpop.f32.mrb[30].mxu1 }
0x1cf8   :  { %v3683_v39 = vpop.f32.mrb[31].mxu1 }
0x1cf9   :  { %v6006_v40 = vpack.c.bf16 %v5637_v38, %v3683_v39 }
0x1cfb   :  { %6008 = vmatprep.subr.msk.bf16.mxu1 %vm6352_vm0, %v6006_v40 }
0x1cfc   :  { %6011 = vmatpush3.bf16.xpose.msk.msra.mxu1 %vm6352_vm0, %v6006_v40 }
0x1cfd   :  { %5663 = vmatprep.subr.mxu1 %v4922_v5 }
0x1d03   :  { %5654 = vmatmul.mubr.msk.f32.vlgmr.msra.gmra.mrb[32].mxu1 %vm454_vm15, %v5626_v33 }
0x1d04   :  { %5664 = vmatpush3.msra.mxu1 %v4922_v5 }
0x1d05   :  { %6025 = vmatprep.subr.bf16.mxu1 %v6024_v21 }
0x1dd6   :  { %v5655_v41 = vpop.f32.mrb[32].mxu1 }
0x1dd7   :  { %v3855_v42 = vmul.f32 0.35355338, %v5655_v41  ;;  %v3845_v43 = vpop.f32.mrb[33].mxu1 }
0x1dd8   :  { %v3854_v46 = vmul.f32 0.35355338, %v3845_v43 }
0x1dd9   :  { %v3857_v47 = vadd.f32 %v3855_v42, %v6368_v4 }
0x1dda   :  { %v3856_v48 = vadd.f32 %v3854_v46, %v6364_v0 }
0x1ddb   :  { %v3861_v49 = vsel %vm546_vm2, %v3857_v47, -inf }
0x1ddc   :  { %3862 = vmax.xlane.f32.xlu0 %v3861_v49  ;;  %v3858_v52 = vsel %vm546_vm2, %v3856_v48, -inf }
0x1ddd   :  { %3859 = vmax.xlane.f32.xlu1 %v3858_v52 }
0x1e69   :  { %v3863_v53 = vpop.xlane.xlu0 %3862 }
0x1e6a   :  { %v3865_v54 = vsub.f32 %v3857_v47, %v3863_v53  ;;  %v3860_v55 = vpop.xlane.xlu1 %3859 }
0x1e6b   :  { %v3864_v56 = vsub.f32 %v3856_v48, %v3860_v55 }
0x1e6c   :  { %v3868_v58 = vmul.f32 1.442695, %v3865_v54  ;;  %v4923_v54 = vld [vmem:[%s6976_s7 + $0x38] sm:$0xff] }
0x1e6d   :  { %v3866_v59 = vmul.f32 1.442695, %v3864_v56 }
0x1e6e   :  { %6151 = vpow2.f32 %v3868_v58 }
0x1e6f   :  { %6153 = vpow2.f32 %v3866_v59 }
0x1e78   :  { %v6152_v60 = vpop.eup %6151 }
0x1e79   :  { %v6154_v61 = vpop.eup %6153  ;;  %v3873_v62 = vsel %vm546_vm2, %v6152_v60, 0.0 }
0x1e7a   :  { %3874 = vadd.xlane.f32.xlu0 %v3873_v62  ;;  %v3870_v63 = vsel %vm546_vm2, %v6154_v61, 0.0 }
0x1e7b   :  { %3871 = vadd.xlane.f32.xlu1 %v3870_v63 }
0x1f07   :  { %v3875_v6 = vpop.xlane.xlu0 %3874 }
0x1f08   :  { %6155 = vrcp.f32 %v3875_v6  ;;  %v3872_v7 = vpop.xlane.xlu1 %3871 }
0x1f09   :  { %6157 = vrcp.f32 %v3872_v7 }
0x1f12   :  { %v6156_v8 = vpop.eup %6155 }
0x1f13   :  { %v6158_v11 = vpop.eup %6157  ;;  %v3879_v13 = vmul.f32 %v6156_v8, %v6152_v60 }
0x1f14   :  { %v3878_v12 = vmul.f32 %v6158_v11, %v6154_v61 }
0x1f16   :  { %5660 = vmatprep.mubr.msk.f32.mxu0 %vm546_vm2, %v3878_v12  ;;  %v4982_v12 = vld [vmem:[%s6977_s8 + $0x30] sm:$0xff] }
0x1f17   :  { %5661 = vmatmul.mubr.msk.f32.vlgmr.msra.gmra.mrb[44].mxu0 %vm546_vm2, %v3879_v13 }
0x1f18   :  { %6019 = vmatpush3.bf16.msra.mxu0 %v6016_v3  ;;  %5676 = vmatprep.mubr.msk.f32.mxu0 %vm222_vm14, %v6670_v44 }
0x1f19   :  { %6021 = vmatprep.subr.bf16.mxu0 %v6020_v14 }
0x1f1c   :  { %6023 = vmatpush3.bf16.msra.mxu0 %v6020_v14  ;;  %v4983_v14 = vld [vmem:[%s6977_s8 + $0x38] sm:$0xff] }
0x1f1d   :  { %6033 = vmatprep.subr.bf16.mxu0 %v6032_v17  ;;  %v6054_v15 = vpack.c.bf16 %v4983_v14, %v4982_v12 }
0x1f1f   :  { %5677 = vmatmul.mubr.msk.f32.vlgmr.msra.gmra.mrb[46].mxu0 %vm222_vm14, %v6672_v45 }
0x1f20   :  { %6035 = vmatpush3.bf16.msra.mxu0 %v6032_v17  ;;  %5698 = vmatprep.mubr.msk.f32.mxu0 %vm222_vm14, %v6670_v44  ;;  %v4987_v17 = vld [vmem:[%s6978_s9 + $0x48] sm:$0xff] }
0x1f21   :  { %6037 = vmatprep.subr.bf16.mxu0 %v6036_v51  ;;  %v6058_v19 = vpack.c.bf16 %v4987_v17, %v4986_v16 }
0x1f24   :  { %6039 = vmatpush3.bf16.msra.mxu0 %v6036_v51  ;;  %v4989_v51 = vld [vmem:[%s6978_s9 + $0x58] sm:$0xff] }
0x1f25   :  { %v6062_v50 = vpack.c.bf16 %v4989_v51, %v4988_v18 }
0x1f27   :  { %5699 = vmatmul.mubr.msk.f32.vlgmr.msra.gmra.mrb[48].mxu0 %vm222_vm14, %v6672_v45 }
0x1fea   :  { %v5662_v24 = vpop.f32.mrb[44].mxu0 }
0x1feb   :  { %v3952_v25 = vpop.f32.mrb[45].mxu0 }
0x1fec   :  { %5665 = vmatprep.mubr.msk.f32.mxu1 %vm454_vm15, %v3952_v25 }
0x1fed   :  { %5666 = vmatmul.mubr.msk.f32.vlgmr.msra.gmra.mrb[24].mxu1 %vm454_vm15, %v5662_v24 }
0x1fee   :  { %6027 = vmatpush3.bf16.msra.mxu1 %v6024_v21  ;;  %5687 = vmatprep.mubr.msk.f32.mxu1 %vm222_vm14, %v6670_v44  ;;  %v4991_v21 = vld [vmem:[%s6978_s9 + $0x68] sm:$0xff] }
0x1fef   :  { %6029 = vmatprep.subr.bf16.mxu1 %v6028_v26  ;;  %v6066_v22 = vpack.c.bf16 %v4991_v21, %v4990_v20 }
0x1ff2   :  { %v5678_v27 = vpop.f32.mrb[46].mxu0  ;;  %6031 = vmatpush3.bf16.msra.mxu1 %v6028_v26 }
0x1ff3   :  { %v4110_v28 = vpop.f32.mrb[47].mxu0 }
0x1ff5   :  { %5688 = vmatmul.mubr.msk.f32.vlgmr.msra.gmra.mrb[34].mxu1 %vm222_vm14, %v6672_v45 }
0x1ff6   :  { %5705 = vmatprep.mubr.msk.f32.mxu1 %vm454_vm15, %v4110_v28 }
0x1ffa   :  { %v5700_v29 = vpop.f32.mrb[48].mxu0 }
0x1ffb   :  { %v4260_v30 = vpop.f32.mrb[49].mxu0 }
0x1ffc   :  { %v6046_v31 = vpack.c.bf16 %v5700_v29, %v4260_v30 }
0x1ffe   :  { %6047 = vmatprep.subr.bf16.mxu0 %v6046_v31 }
0x1fff   :  { %6049 = vmatpush3.bf16.msra.mxu0 %v6046_v31 }
0x20c8   :  { %v5689_v32 = vpop.f32.mrb[34].mxu1 }
0x20c9   :  { %v4185_v33 = vpop.f32.mrb[35].mxu1 }
0x20ca   :  { %v6040_v34 = vpack.c.bf16 %v5689_v32, %v4185_v33 }
0x20cc   :  { %6042 = vmatprep.subr.msk.bf16.mxu1 %vm6352_vm0, %v6040_v34 }
0x20cd   :  { %6045 = vmatpush3.bf16.xpose.msk.msra.mxu1 %vm6352_vm0, %v6040_v34 }
0x20ce   :  { %5715 = vmatprep.subr.mxu1 %v4923_v54 }
0x20d4   :  { %5706 = vmatmul.mubr.msk.f32.vlgmr.msra.gmra.mrb[36].mxu1 %vm454_vm15, %v5678_v27 }
0x20d5   :  { %5716 = vmatpush3.msra.mxu1 %v4923_v54 }
0x20d6   :  { %6059 = vmatprep.subr.bf16.mxu1 %v6058_v19 }
0x21a7   :  { %v5707_v35 = vpop.f32.mrb[36].mxu1 }
0x21a8   :  { %v4357_v36 = vmul.f32 0.35355338, %v5707_v35  ;;  %v4347_v37 = vpop.f32.mrb[37].mxu1 }
0x21a9   :  { %v4356_v38 = vmul.f32 0.35355338, %v4347_v37 }
0x21aa   :  { %v4359_v39 = vadd.f32 %v4357_v36, %v6368_v4 }
0x21ab   :  { %v4358_v40 = vadd.f32 %v4356_v38, %v6364_v0 }
0x21ac   :  { %v4363_v41 = vsel %vm546_vm2, %v4359_v39, -inf }
0x21ad   :  { %4364 = vmax.xlane.f32.xlu0 %v4363_v41  ;;  %v4360_v42 = vsel %vm546_vm2, %v4358_v40, -inf }
0x21ae   :  { %4361 = vmax.xlane.f32.xlu1 %v4360_v42 }
0x223a   :  { %v4365_v43 = vpop.xlane.xlu0 %4364 }
0x223b   :  { %v4367_v46 = vsub.f32 %v4359_v39, %v4365_v43  ;;  %v4362_v57 = vpop.xlane.xlu1 %4361  ;;  %v4992_v43 = vld [vmem:[%s6978_s9 + $0x70] sm:$0xff] }
0x223c   :  { %v4366_v47 = vsub.f32 %v4358_v40, %v4362_v57 }
0x223d   :  { %v4370_v48 = vmul.f32 1.442695, %v4367_v46  ;;  %v4993_v46 = vld [vmem:[%s6978_s9 + $0x78] sm:$0xff]  ;;  %s6202_s9 = smov [#allocation2]  }
0x223e   :  { %v4368_v49 = vmul.f32 1.442695, %v4366_v47  ;;  %v6070_v57 = vpack.c.bf16 %v4993_v46, %v4992_v43  ;;  %s4799_s15 = sshll.u32 %s6202_s9, 4  ;;  %s4800_s15 = int_to_ptr.vmem [resolvable:$true] %s4799_s15 }
0x223f   :  { %6159 = vpow2.f32 %v4370_v48  ;;  %s6175_s16 = scalar_lea.vmem %s4800_s15, 32  ;;  %p6180_p1 = scmp.lt.s32.totalorder %s4800_s15, %s4800_s15 }
0x2240   :  { %6161 = vpow2.f32 %v4368_v49  ;;  %p6176_p0 = scmp.ne.s32.totalorder %s4800_s15, %s6175_s16  ;;  %p6181_p2 = scmp.lt.s32.totalorder %s6175_s16, %s6175_s16 }
0x2242   :  { %p6182_p3 = por %p6181_p2, %p6180_p1 }
0x2244   :  { %p6183_p4 = pnand %p6182_p3, %p6176_p0 }
0x2249   :  { %v6160_v52 = vpop.eup %6159 }
0x224a   :  { %v6162_v53 = vpop.eup %6161  ;;  %v4375_v4 = vsel %vm546_vm2, %v6160_v52, 0.0 }
0x224b   :  { %4376 = vadd.xlane.f32.xlu0 %v4375_v4  ;;  %v4372_v0 = vsel %vm546_vm2, %v6162_v53, 0.0 }
0x224c   :  { %4373 = vadd.xlane.f32.xlu1 %v4372_v0 }
0x22d8   :  { %v4377_v55 = vpop.xlane.xlu0 %4376 }
0x22d9   :  { %6163 = vrcp.f32 %v4377_v55  ;;  %v4374_v56 = vpop.xlane.xlu1 %4373 }
0x22da   :  { %6165 = vrcp.f32 %v4374_v56 }
0x22e3   :  { %v6164_v58 = vpop.eup %6163 }
0x22e4   :  { %v6166_v59 = vpop.eup %6165  ;;  %v4381_v61 = vmul.f32 %v6164_v58, %v6160_v52 }
0x22e5   :  { %v4380_v60 = vmul.f32 %v6166_v59, %v6162_v53 }
0x22e7   :  { %5712 = vmatprep.mubr.msk.f32.mxu0 %vm546_vm2, %v4380_v60 }
0x22e8   :  { %5713 = vmatmul.mubr.msk.f32.vlgmr.msra.gmra.mrb[50].mxu0 %vm546_vm2, %v4381_v61 }
0x23bb   :  { %v5714_v62 = vpop.f32.mrb[50].mxu0 }
0x23bc   :  { %v4454_v63 = vpop.f32.mrb[51].mxu0 }
0x23bd   :  { %5717 = vmatprep.mubr.msk.f32.mxu1 %vm454_vm15, %v4454_v63 }
0x23be   :  { %5718 = vmatmul.mubr.msk.f32.vlgmr.msra.gmra.mrb[24].mxu1 %vm454_vm15, %v5714_v62 }
0x23bf   :  { %6061 = vmatpush3.bf16.msra.mxu1 %v6058_v19 }
0x23c0   :  { %6063 = vmatprep.subr.bf16.mxu1 %v6062_v50 }
0x23c3   :  { %6065 = vmatpush3.bf16.msra.mxu1 %v6062_v50 }
0x23c4   :  { %6067 = vmatprep.subr.bf16.mxu1 %v6066_v22 }
0x23c7   :  { %6069 = vmatpush3.bf16.msra.mxu1 %v6066_v22 }
0x23c8   :  { %6071 = vmatprep.subr.bf16.mxu1 %v6070_v57 }
0x23cb   :  { %6073 = vmatpush3.bf16.msra.mxu1 %v6070_v57 }
0x2491   :  { %v5719_v1 = vpop.f32.mrb[24].mxu1 }
0x2492   :  { %v6076_v2 = vadd.f32 %v5719_v1, %v6672_v45  ;;  %v4535_v3 = vpop.f32.mrb[25].mxu1  ;;  %v4980_v45 = vld [vmem:[%s6977_s8 + $0x20] sm:$0xff] }
0x2493   :  { %v6077_v5 = vadd.f32 %v4535_v3, %v6670_v44  ;;  %v4981_v44 = vld [vmem:[%s6977_s8 + $0x28] sm:$0xff] }
0x2494   :  { %v4549_v6 = vsel %vm222_vm14, %v6076_v2, 0.0  ;;  %v4555_v7 = vmul.f32 %v6076_v2, %v6076_v2  ;;  %v6050_v13 = vpack.c.bf16 %v4981_v44, %v4980_v45 }
0x2495   :  { %4550 = vadd.xlane.f32.xlu0 %v4549_v6  ;;  %v4546_v8 = vsel %vm222_vm14, %v6077_v5, 0.0  ;;  %v4554_v9 = vmul.f32 %v6077_v5, %v6077_v5 }
0x2496   :  { %4547 = vadd.xlane.f32.xlu1 %v4546_v8  ;;  %v4559_v10 = vsel %vm222_vm14, %v4555_v7, 0.0  ;;  %6051 = vmatprep.subr.bf16.mxu0 %v6050_v13 }
0x2497   :  { %v4556_v11 = vsel %vm222_vm14, %v4554_v9, 0.0  ;;  %6053 = vmatpush3.bf16.msra.mxu0 %v6050_v13 }
0x2498   :  { %6055 = vmatprep.subr.bf16.mxu0 %v6054_v15 }
0x2499   :  { %4560 = vadd.xlane.f32.xlu0 %v4559_v10 }
0x249a   :  { %4557 = vadd.xlane.f32.xlu1 %v4556_v11 }
0x249b   :  { %6057 = vmatpush3.bf16.msra.mxu0 %v6054_v15 }
0x2522   :  { %v4551_v23 = vpop.xlane.xlu0 %4550 }
0x2523   :  { %v4553_v24 = vmul.f32 0.03125, %v4551_v23  ;;  %v4548_v25 = vpop.xlane.xlu1 %4547 }
0x2524   :  { %v4552_v26 = vmul.f32 0.03125, %v4548_v25 }
0x2525   :  { %v4565_v28 = vmul.f32 %v4553_v24, %v4553_v24  ;;  %v4569_v40 = vsub.f32 %v6076_v2, %v4553_v24 }
0x2526   :  { %v4561_v27 = vpop.xlane.xlu0 %4560  ;;  %v4564_v31 = vmul.f32 %v4552_v26, %v4552_v26  ;;  %v4568_v38 = vsub.f32 %v6077_v5, %v4552_v26 }
0x2527   :  { %v4563_v29 = vmul.f32 0.03125, %v4561_v27  ;;  %v4558_v30 = vpop.xlane.xlu1 %4557 }
0x2528   :  { %v4562_v32 = vmul.f32 0.03125, %v4558_v30 }
0x2529   :  { %v4567_v33 = vsub.f32 %v4563_v29, %v4565_v28 }
0x252a   :  { %v4566_v34 = vsub.f32 %v4562_v32, %v4564_v31 }
0x252b   :  { %v4571_v35 = vadd.f32 1e-05, %v4567_v33 }
0x252c   :  { %v4570_v36 = vadd.f32 1e-05, %v4566_v34 }
0x252d   :  { %6167 = vrsqrt.f32 %v4571_v35 }
0x252e   :  { %6169 = vrsqrt.f32 %v4570_v36 }
0x2537   :  { %v6168_v37 = vpop.eup %6167 }
0x2538   :  { %v6170_v39 = vpop.eup %6169  ;;  %v4575_v42 = vmul.f32 %v6168_v37, %v4569_v40 }
0x2539   :  { %v4574_v41 = vmul.f32 %v6170_v39, %v4568_v38 }
0x253b   :  { %5728 = vmatprep.mubr.msk.f32.mxu0 %vm222_vm14, %v4574_v41 }
0x253c   :  { %5729 = vmatmul.mubr.msk.f32.vlgmr.msra.gmra.mrb[52].mxu0 %vm222_vm14, %v4575_v42 }
0x260f   :  { %v5730_v47 = vpop.f32.mrb[52].mxu0 }
0x2610   :  { %v4653_v48 = vpop.f32.mrb[53].mxu0  ;;  %v4663_v52 = vmax.f32 %v5730_v47, 0.0 }
0x2611   :  { %v4662_v49 = vmax.f32 %v4653_v48, 0.0 }
0x2613   :  { %5747 = vmatprep.mubr.msk.f32.mxu1 %vm2364_vm3, %v4662_v49 }
0x2614   :  { %5748 = vmatmul.mubr.msk.f32.vlgmr.msra.gmra.mrb[38].mxu1 %vm2364_vm3, %v4663_v52 }
0x26e7   :  { %v5749_v53 = vpop.f32.mrb[38].mxu1 }
0x26e8   :  { %v4751_v4 = vadd.f32 %v5749_v53, %v4575_v42  ;;  %v4745_v0 = vpop.f32.mrb[39].mxu1 }
0x26e9   :  { %v4746_v54 = vadd.f32 %v4745_v0, %v4574_v41 }
0x26ea   :  { %v4757_v55 = vsel %vm222_vm14, %v4751_v4, 0.0  ;;  %v4763_v56 = vmul.f32 %v4751_v4, %v4751_v4 }
0x26eb   :  { %4758 = vadd.xlane.f32.xlu0 %v4757_v55  ;;  %v4754_v58 = vsel %vm222_vm14, %v4746_v54, 0.0  ;;  %v4762_v59 = vmul.f32 %v4746_v54, %v4746_v54 }
0x26ec   :  { %4755 = vadd.xlane.f32.xlu1 %v4754_v58  ;;  %v4767_v60 = vsel %vm222_vm14, %v4763_v56, 0.0 }
0x26ed   :  { %v4764_v61 = vsel %vm222_vm14, %v4762_v59, 0.0 }
0x26ef   :  { %4768 = vadd.xlane.f32.xlu0 %v4767_v60 }
0x26f0   :  { %4765 = vadd.xlane.f32.xlu1 %v4764_v61 }
0x2778   :  { %v4759_v62 = vpop.xlane.xlu0 %4758 }
0x2779   :  { %v4761_v63 = vmul.f32 0.03125, %v4759_v62  ;;  %v4756_v1 = vpop.xlane.xlu1 %4755 }
0x277a   :  { %v4760_v2 = vmul.f32 0.03125, %v4756_v1 }
0x277b   :  { %v4773_v5 = vmul.f32 %v4761_v63, %v4761_v63  ;;  %v4777_v12 = vsub.f32 %v4751_v4, %v4761_v63 }
0x277c   :  { %v4769_v3 = vpop.xlane.xlu0 %4768  ;;  %v4772_v8 = vmul.f32 %v4760_v2, %v4760_v2  ;;  %v4776_v14 = vsub.f32 %v4746_v54, %v4760_v2 }
0x277d   :  { %v4771_v6 = vmul.f32 0.03125, %v4769_v3  ;;  %v4766_v7 = vpop.xlane.xlu1 %4765 }
0x277e   :  { %v4770_v9 = vmul.f32 0.03125, %v4766_v7 }
0x277f   :  { %v4775_v10 = vsub.f32 %v4771_v6, %v4773_v5 }
0x2780   :  { %v4774_v11 = vsub.f32 %v4770_v9, %v4772_v8 }
0x2781   :  { %v4779_v45 = vadd.f32 1e-05, %v4775_v10 }
0x2782   :  { %v4778_v44 = vadd.f32 1e-05, %v4774_v11 }
0x2783   :  { %6171 = vrsqrt.f32 %v4779_v45 }
0x2784   :  { %6173 = vrsqrt.f32 %v4778_v44 }
0x278d   :  { %v6172_v13 = vpop.eup %6171 }
0x278e   :  { %v6174_v15 = vpop.eup %6173  ;;  %v4783_v16 = vmul.f32 %v6172_v13, %v4777_v12 }
0x278f   :  { %v4782_v17 = vmul.f32 %v6174_v15, %v4776_v14 }
0x2790   :  { %v4788_v18 = vrot.slane %v4783_v16, 6 }
0x2791   :  { %v4785_v19 = vrot.slane %v4782_v17, 7 }
0x2793   :  { %v4790_v51 = vsel %vm64_vm1, %v4785_v19, %v4788_v18 }
0x2794   :  { %4792 = vst.msk [vmem:[#allocation2] sm:$0x3] %vm4791_vm4, %v4790_v51 }
0x2795   :  { %6186 = shalt.err (!%p6183_p4)
}
0x2796   :  { %s6187_s18 = scalar_lea.hbm %s6979_s10, 32 }
0x2797   :  { %p6188_p5 = scmp.ne.s32.totalorder %s6979_s10, %s6187_s18  ;;  %p6191_p6 = scmp.lt.u32.totalorder %s6187_s18, %s6979_s10 }
0x2799   :  { %p6193_p7 = pnand %p6191_p6, %p6188_p5 }
0x279b   :  { %6196 = shalt.err (!%p6193_p7)
}
0x279c   :  { %4802 = dma.vmem_to_hbm [thread:$0]  %s4800_s15, 32, %s6979_s10, [#allocation3]  }
0x279d   :  { %6197 = dma.done.wait [#allocation3], 32  }
0x279e   :  { %6198 = vsyncadd [#allocation3], 4294967264 }
0x279f   :  { %4806 = vsyncpa [#allocation3], 1 }

</bundles_post_ra>
